<compile_context>
chip_gen: v7x
topology: tpu7x:2x2x1
jax: 0.10.0
libtpu: 0.0.40
codegen_flags: <defaults>
</compile_context>

<pallas_src>
import functools

import numpy as np
import jax
import jax.numpy as jnp
from jax.experimental import pallas as pl
from jax.experimental.pallas import tpu as pltpu


def _round_up(x, m):
    return ((x + m - 1) // m) * m


def _chip_profile():
    """Chip-aware defaults: MXU lane alignment, elementwise dtype, #parallel TCs."""
    try:
        kind = jax.devices()[0].device_kind.lower()
    except Exception:  # no devices / weird backend: safe defaults
        kind = ""
    is_v5e = ("v5 lite" in kind) or ("v5e" in kind) or ("v5lite" in kind)
    is_v6_plus = ("v6" in kind) or ("v7" in kind)
    lane_align = 256 if is_v6_plus else 128          # 256-wide MXU on v6e/v7x
    act_dtype = jnp.bfloat16 if is_v6_plus else jnp.float32  # v5e VALU has no bf16
    # v7x has 2 TensorCores/chip; v4/v5p expose megacore similarly.
    two_tc = ("v7" in kind) or ("v4" in kind) or (("v5" in kind) and not is_v5e)
    min_parallel_blocks = 2 if two_tc else 1
    return lane_align, act_dtype, min_parallel_blocks


def _choose_point_tiling(points_nb, batch, *, lane_align, tile_cap,
                         min_parallel_blocks):
    """Pick (tile_n, n_pad): tile_n multiple of lane_align (>=128), divides n_pad,
    bounded by tile_cap (VMEM), and batch*n_tiles >= min_parallel_blocks."""
    n_aligned = _round_up(points_nb, lane_align)
    n_tiles = max(1, -(-n_aligned // tile_cap))
    if batch * n_tiles < min_parallel_blocks:
        n_tiles = -(-min_parallel_blocks // max(batch, 1))
    tile_n = max(128, _round_up(-(-points_nb // n_tiles), lane_align))
    return tile_n, tile_n * n_tiles


def _atlas_decoder_kernel(rand_ref, c1_ref, w1a_ref,
                          w2_ref, b2_ref, w3_ref, b3_ref, w4_ref, b4_ref,
                          out_ref, *, inv_out_factor, act_dtype):
    """One (batch, point-tile) step.  Channel-major: activations are
    (channels, tile_n) with points on the lane dim."""
    rand = rand_ref[0]                                   # (3, tile_n) f32
    r0, r1, r2 = rand[0:1, :], rand[1:2, :], rand[2:3, :]
    # rand / sqrt(sum(rand**2, dim=coords)) — 3 explicit slice products keep the
    # tiny reduction on the VPU instead of a cross-sublane XLU reduce.
    inv_norm = jax.lax.rsqrt(r0 * r0 + r1 * r1 + r2 * r2)
    s0 = (r0 * inv_norm).astype(act_dtype)
    s1 = (r1 * inv_norm).astype(act_dtype)
    s2 = (r2 * inv_norm).astype(act_dtype)

    # Side inputs are lane-padded to 128 in the wrapper: these are unmasked
    # full-block loads; lane broadcasts happen on the in-register slices.
    w1a = w1a_ref[...]                                   # (d0, 128) act_dtype
    c1 = c1_ref[0][:, 0:1].astype(act_dtype)             # (d0, 1)

    # conv1 (+BN fold, +residual, ReLU): coordinate part as 3 VPU broadcast-FMAs
    # (a K=3 MXU matmul would waste >97% of the contraction depth).  The per-batch
    # image-feature part of conv1 (+bias, +feature residual) is precomputed in
    # the wrapper and arrives as c1; the coordinate residual is folded into w1a.
    h = w1a[:, 0:1] * s0 + w1a[:, 1:2] * s1 + w1a[:, 2:3] * s2
    h = jnp.maximum(h + c1, 0)                           # (d0, tile_n) act_dtype

    # conv2 / conv3: MXU matmuls (bf16 operands, f32 accumulation); bias-add +
    # ReLU + downcast fused as a single act_dtype pass on the accumulator.
    a2 = jnp.dot(w2_ref[...], h.astype(jnp.bfloat16),
                 preferred_element_type=jnp.float32)
    h = jnp.maximum(a2.astype(act_dtype) + b2_ref[...][:, 0:1], 0)   # (d2, tile_n)
    a3 = jnp.dot(w3_ref[...], h.astype(jnp.bfloat16),
                 preferred_element_type=jnp.float32)
    h = jnp.maximum(a3.astype(act_dtype) + b3_ref[...][:, 0:1], 0)   # (d3, tile_n)

    # conv4 (3 output channels): keep f32 for tanh / scale / store.
    a4 = jnp.dot(w4_ref[...], h.astype(jnp.bfloat16),
                 preferred_element_type=jnp.float32)
    out_ref[0] = jnp.tanh(a4 + b4_ref[...][:, 0:1]) * inv_out_factor  # (3, tile_n)


def init_atlas_decoder_params(key, bottleneck_size, eps=1e-5):
    """Deterministic synthetic params for PointGenConResidual, BN folded (eval).

    Stored point-major (w{i}t is (cin, cout) for x @ W; b{i} is (1, cout)) so the
    pure-JAX reference mirrors the PyTorch math directly."""
    d0 = 3 + bottleneck_size
    d2 = d0 // 2
    d3 = d0 // 4
    layer_dims = [(d0, d0), (d2, d0), (d3, d2), (3, d3)]  # (out, in) per 1x1 conv
    keys = jax.random.split(key, 6 * len(layer_dims))
    folded = {}
    for i, (cout, cin) in enumerate(layer_dims):
        kw, kb, kg, kbe, km, kv = keys[6 * i: 6 * i + 6]
        bound = 1.0 / np.sqrt(cin)
        w = jax.random.uniform(kw, (cout, cin), jnp.float32, -bound, bound)
        b = jax.random.uniform(kb, (cout,), jnp.float32, -bound, bound)
        if i < 3:  # conv1..conv3 are followed by BatchNorm1d (eval-mode fold)
            gamma = jax.random.uniform(kg, (cout,), jnp.float32, 0.9, 1.1)
            beta = jax.random.uniform(kbe, (cout,), jnp.float32, -0.1, 0.1)
            mean = jax.random.uniform(km, (cout,), jnp.float32, -0.1, 0.1)
            var = jax.random.uniform(kv, (cout,), jnp.float32, 0.8, 1.2)
            scale = gamma / jnp.sqrt(var + eps)
            w_eff = w * scale[:, None]
            b_eff = (b - mean) * scale + beta
        else:
            w_eff, b_eff = w, b
        folded[f"w{i + 1}t"] = w_eff.T            # (cin, cout)
        folded[f"b{i + 1}"] = b_eff[None, :]      # (1, cout)
    return folded


def atlas_branch_forward(img_features, rand_grid, params, *,
                         out_factor=200.0, tile_n=None, tile_cap=768,
                         act_dtype=None, lane_align=None, vmem_limit_bytes=None):
    """AtlasBranch.forward.  rand_grid plays the role of the in-forward torch
    normal_() draw and is supplied in PyTorch's native (B, 3, points_nb) layout."""
    B, F = img_features.shape
    _, _three, points_nb = rand_grid.shape
    d0 = 3 + F
    d2 = d0 // 2
    d3 = d0 // 4

    auto_align, auto_act, min_parallel = _chip_profile()
    if lane_align is None:
        lane_align = auto_align
    if act_dtype is None:
        act_dtype = auto_act

    if tile_n is None:
        tile_n, n_pad = _choose_point_tiling(
            points_nb, B, lane_align=lane_align, tile_cap=tile_cap,
            min_parallel_blocks=min_parallel)
    else:
        assert tile_n % 128 == 0
        n_pad = _round_up(points_nb, tile_n)

    # Padding rows are 1.0 (not 0.0) so the sphere normalization stays finite;
    # padded columns never mix with real columns (contractions are over channels).
    rand = rand_grid.astype(jnp.float32)
    if n_pad != points_nb:
        pad = jnp.ones((B, 3, n_pad - points_nb), jnp.float32)
        rand = jnp.concatenate([rand, pad], axis=2)

    # Fold the conv1 residual into the weight (W + I).  Coordinate columns stay
    # in the kernel; the image-feature columns are constant per batch and are
    # hoisted here (default matmul precision — the kernel is bf16 MXU anyway).
    w1t_res = params["w1t"] + jnp.eye(d0, dtype=jnp.float32)        # x @ W form
    c1 = jnp.matmul(img_features.astype(jnp.float32), w1t_res[3:, :]) \
        + params["b1"]                                              # (B, d0)
    c1 = jnp.broadcast_to(c1[:, :, None], (B, d0, 128))             # lane-dense

    mxu = jnp.bfloat16
    w1a = jnp.pad(jnp.transpose(w1t_res[:3, :]),
                  ((0, 0), (0, 125))).astype(act_dtype)             # (d0, 128)
    w2 = jnp.transpose(params["w2t"]).astype(mxu)                   # (d2, d0)
    w3 = jnp.transpose(params["w3t"]).astype(mxu)                   # (d3, d2)
    w4 = jnp.transpose(params["w4t"]).astype(mxu)                   # (3,  d3)
    b2 = jnp.broadcast_to(jnp.transpose(params["b2"]), (d2, 128)).astype(act_dtype)
    b3 = jnp.broadcast_to(jnp.transpose(params["b3"]), (d3, 128)).astype(act_dtype)
    b4 = jnp.broadcast_to(jnp.transpose(params["b4"]), (3, 128)).astype(jnp.float32)

    grid = (B, n_pad // tile_n)
    kernel = functools.partial(_atlas_decoder_kernel,
                               inv_out_factor=1.0 / out_factor,
                               act_dtype=act_dtype)
    cp_kwargs = dict(dimension_semantics=("parallel", "parallel"))
    if vmem_limit_bytes is not None:
        cp_kwargs["vmem_limit_bytes"] = vmem_limit_bytes

    out_cm = pl.pallas_call(
        kernel,
        out_shape=jax.ShapeDtypeStruct((B, 3, n_pad), jnp.float32),
        grid=grid,
        in_specs=[
            pl.BlockSpec((1, 3, tile_n), lambda b, t: (b, 0, t)),   # rand_grid
            pl.BlockSpec((1, d0, 128), lambda b, t: (b, 0, 0)),     # hoisted c1
            pl.BlockSpec((d0, 128), lambda b, t: (0, 0)),           # w1a (coords)
            pl.BlockSpec((d2, d0), lambda b, t: (0, 0)),            # w2
            pl.BlockSpec((d2, 128), lambda b, t: (0, 0)),           # b2
            pl.BlockSpec((d3, d2), lambda b, t: (0, 0)),            # w3
            pl.BlockSpec((d3, 128), lambda b, t: (0, 0)),           # b3
            pl.BlockSpec((3, d3), lambda b, t: (0, 0)),             # w4
            pl.BlockSpec((3, 128), lambda b, t: (0, 0)),            # b4
        ],
        out_specs=pl.BlockSpec((1, 3, tile_n), lambda b, t: (b, 0, t)),
        compiler_params=pltpu.CompilerParams(**cp_kwargs),
    )(rand, c1, w1a, w2, b2, w3, b3, w4, b4)

    # Drop the point padding and return in PyTorch's (B, points_nb, 3) layout.
    verts = jnp.transpose(out_cm[:, :, :points_nb], (0, 2, 1))
    return {"objpoints3d": verts}


def reference_forward(img_features, rand_grid, params, out_factor):
    """Pure-JAX reference mirroring the PyTorch forward (for sanity checking)."""
    B, _, N = rand_grid.shape
    F = img_features.shape[1]
    sphere = rand_grid / jnp.sqrt(
        jnp.sum(rand_grid * rand_grid, axis=1, keepdims=True))     # (B, 3, N)
    feat_b = jnp.broadcast_to(img_features[:, :, None], (B, F, N))
    x0 = jnp.transpose(jnp.concatenate([sphere, feat_b], axis=1), (0, 2, 1))
    hp = jax.lax.Precision.HIGHEST
    h = jax.nn.relu(jnp.matmul(x0, params["w1t"], precision=hp)
                    + params["b1"] + x0)                           # residual conv1
    h = jax.nn.relu(jnp.matmul(h, params["w2t"], precision=hp) + params["b2"])
    h = jax.nn.relu(jnp.matmul(h, params["w3t"], precision=hp) + params["b3"])
    return jnp.tanh(jnp.matmul(h, params["w4t"], precision=hp)
                    + params["b4"]) / out_factor                   # (B, N, 3)


if __name__ == "__main__":
    B = 2
    bottleneck_size = 64       # module default 1024, small for the demo
    points_nb = 600            # module default; exercises point-dim padding
    out_factor = 200.0

    key = jax.random.PRNGKey(0)
    k_feat, k_rand, k_params = jax.random.split(key, 3)
    img_features = jax.random.normal(k_feat, (B, bottleneck_size), jnp.float32)
    rand_grid = jax.random.normal(k_rand, (B, 3, points_nb), jnp.float32)
    params = init_atlas_decoder_params(k_params, bottleneck_size)

    results = atlas_branch_forward(img_features, rand_grid, params,
                                   out_factor=out_factor)
    verts = jax.block_until_ready(results["objpoints3d"])
    assert verts.shape == (B, points_nb, 3)
    assert bool(jnp.all(jnp.isfinite(verts)))

    ref = reference_forward(img_features, rand_grid, params, out_factor)
    # Kernel runs the MXU matmuls with bf16 operands (f32 accumulation) and, on
    # v6e/v7x, bf16 inter-layer activations; the reference uses f32 HIGHEST
    # precision, hence the relaxed tolerance.
    np.testing.assert_allclose(np.asarray(verts), np.asarray(ref),
                               rtol=4e-2, atol=6e-4)
    print("KERNEL_OK")
</pallas_src>

<mosaic_0001>
module attributes {stable_mosaic.version = 11 : i64} {
  func.func @_atlas_decoder_kernel(%arg0: i32, %arg1: i32, %arg2: memref<1x3x640xf32, #tpu.memory_space<vmem>>, %arg3: memref<1x67x128xf32, #tpu.memory_space<vmem>>, %arg4: memref<67x128xf32, #tpu.memory_space<vmem>>, %arg5: memref<33x67xbf16, #tpu.memory_space<vmem>>, %arg6: memref<33x128xf32, #tpu.memory_space<vmem>>, %arg7: memref<16x33xbf16, #tpu.memory_space<vmem>>, %arg8: memref<16x128xf32, #tpu.memory_space<vmem>>, %arg9: memref<3x16xbf16, #tpu.memory_space<vmem>>, %arg10: memref<3x128xf32, #tpu.memory_space<vmem>>, %arg11: memref<1x3x640xf32, #tpu.memory_space<vmem>>) attributes {dimension_semantics = [#tpu.dimension_semantics<parallel>, #tpu.dimension_semantics<parallel>], iteration_bounds = array<i64: 2, 1>, scalar_prefetch = 0 : i64, scratch_operands = 0 : i64, tpu.core_type = #tpu.core_type<tc>, window_params = [{transform_indices = @transform_0, window_bounds = array<i64: 1, 3, 640>}, {transform_indices = @transform_1, window_bounds = array<i64: 1, 67, 128>}, {pipeline_mode = #tpu.pipeline_mode<synchronous>, transform_indices = @transform_2, window_bounds = array<i64: 67, 128>}, {pipeline_mode = #tpu.pipeline_mode<synchronous>, transform_indices = @transform_3, window_bounds = array<i64: 33, 67>}, {pipeline_mode = #tpu.pipeline_mode<synchronous>, transform_indices = @transform_4, window_bounds = array<i64: 33, 128>}, {pipeline_mode = #tpu.pipeline_mode<synchronous>, transform_indices = @transform_5, window_bounds = array<i64: 16, 33>}, {pipeline_mode = #tpu.pipeline_mode<synchronous>, transform_indices = @transform_6, window_bounds = array<i64: 16, 128>}, {pipeline_mode = #tpu.pipeline_mode<synchronous>, transform_indices = @transform_7, window_bounds = array<i64: 3, 16>}, {pipeline_mode = #tpu.pipeline_mode<synchronous>, transform_indices = @transform_8, window_bounds = array<i64: 3, 128>}, {transform_indices = @transform_9, window_bounds = array<i64: 1, 3, 640>}]} {
    %c0 = arith.constant 0 : index
    %c0_0 = arith.constant 0 : index
    %c0_1 = arith.constant 0 : index
    %0 = vector.load %arg2[%c0, %c0_0, %c0_1] : memref<1x3x640xf32, #tpu.memory_space<vmem>>, vector<1x3x640xf32>
    %1 = vector.shape_cast %0 : vector<1x3x640xf32> to vector<3x640xf32>
    %2 = vector.extract_strided_slice %1 {offsets = [0, 0], sizes = [1, 640], strides = [1, 1]} : vector<3x640xf32> to vector<1x640xf32>
    %3 = vector.extract_strided_slice %1 {offsets = [1, 0], sizes = [1, 640], strides = [1, 1]} : vector<3x640xf32> to vector<1x640xf32>
    %4 = vector.extract_strided_slice %1 {offsets = [2, 0], sizes = [1, 640], strides = [1, 1]} : vector<3x640xf32> to vector<1x640xf32>
    %5 = arith.mulf %2, %2 : vector<1x640xf32>
    %6 = arith.mulf %3, %3 : vector<1x640xf32>
    %7 = arith.addf %5, %6 : vector<1x640xf32>
    %8 = arith.mulf %4, %4 : vector<1x640xf32>
    %9 = arith.addf %7, %8 : vector<1x640xf32>
    %10 = math.rsqrt %9 : vector<1x640xf32>
    %11 = arith.mulf %2, %10 : vector<1x640xf32>
    %12 = arith.mulf %3, %10 : vector<1x640xf32>
    %13 = arith.mulf %4, %10 : vector<1x640xf32>
    %c0_2 = arith.constant 0 : index
    %c0_3 = arith.constant 0 : index
    %14 = vector.load %arg4[%c0_2, %c0_3] : memref<67x128xf32, #tpu.memory_space<vmem>>, vector<67x128xf32>
    %c0_4 = arith.constant 0 : index
    %c0_5 = arith.constant 0 : index
    %c0_6 = arith.constant 0 : index
    %15 = vector.load %arg3[%c0_4, %c0_5, %c0_6] : memref<1x67x128xf32, #tpu.memory_space<vmem>>, vector<1x67x128xf32>
    %16 = vector.shape_cast %15 : vector<1x67x128xf32> to vector<67x128xf32>
    %17 = vector.extract_strided_slice %16 {offsets = [0, 0], sizes = [67, 1], strides = [1, 1]} : vector<67x128xf32> to vector<67x1xf32>
    %18 = vector.extract_strided_slice %14 {offsets = [0, 0], sizes = [67, 1], strides = [1, 1]} : vector<67x128xf32> to vector<67x1xf32>
    %19 = vector.broadcast %18 : vector<67x1xf32> to vector<67x640xf32>
    %20 = vector.broadcast %11 : vector<1x640xf32> to vector<67x640xf32>
    %21 = arith.mulf %19, %20 : vector<67x640xf32>
    %22 = vector.extract_strided_slice %14 {offsets = [0, 1], sizes = [67, 1], strides = [1, 1]} : vector<67x128xf32> to vector<67x1xf32>
    %23 = vector.broadcast %22 : vector<67x1xf32> to vector<67x640xf32>
    %24 = vector.broadcast %12 : vector<1x640xf32> to vector<67x640xf32>
    %25 = arith.mulf %23, %24 : vector<67x640xf32>
    %26 = arith.addf %21, %25 : vector<67x640xf32>
    %27 = vector.extract_strided_slice %14 {offsets = [0, 2], sizes = [67, 1], strides = [1, 1]} : vector<67x128xf32> to vector<67x1xf32>
    %28 = vector.broadcast %27 : vector<67x1xf32> to vector<67x640xf32>
    %29 = vector.broadcast %13 : vector<1x640xf32> to vector<67x640xf32>
    %30 = arith.mulf %28, %29 : vector<67x640xf32>
    %31 = arith.addf %26, %30 : vector<67x640xf32>
    %32 = vector.broadcast %17 : vector<67x1xf32> to vector<67x640xf32>
    %33 = arith.addf %31, %32 : vector<67x640xf32>
    %cst = arith.constant 0.000000e+00 : f32
    %34 = vector.broadcast %cst : f32 to vector<67x640xf32>
    %35 = arith.maximumf %33, %34 : vector<67x640xf32>
    %c0_7 = arith.constant 0 : index
    %c0_8 = arith.constant 0 : index
    %36 = vector.load %arg5[%c0_7, %c0_8] : memref<33x67xbf16, #tpu.memory_space<vmem>>, vector<33x67xbf16>
    %37 = arith.truncf %35 : vector<67x640xf32> to vector<67x640xbf16>
    %cst_9 = arith.constant dense<0.000000e+00> : vector<33x640xf32>
    %38 = tpu.matmul %36, %37, %cst_9 {dimension_numbers = #tpu.dot_dimension_numbers<[1], [0], [0], [1], [0, 0, 1, 1], [], []>} : vector<33x67xbf16>, vector<67x640xbf16>, vector<33x640xf32> -> vector<33x640xf32>
    %c0_10 = arith.constant 0 : index
    %c0_11 = arith.constant 0 : index
    %39 = vector.load %arg6[%c0_10, %c0_11] : memref<33x128xf32, #tpu.memory_space<vmem>>, vector<33x128xf32>
    %40 = vector.extract_strided_slice %39 {offsets = [0, 0], sizes = [33, 1], strides = [1, 1]} : vector<33x128xf32> to vector<33x1xf32>
    %41 = vector.broadcast %40 : vector<33x1xf32> to vector<33x640xf32>
    %42 = arith.addf %38, %41 : vector<33x640xf32>
    %cst_12 = arith.constant 0.000000e+00 : f32
    %43 = vector.broadcast %cst_12 : f32 to vector<33x640xf32>
    %44 = arith.maximumf %42, %43 : vector<33x640xf32>
    %c0_13 = arith.constant 0 : index
    %c0_14 = arith.constant 0 : index
    %45 = vector.load %arg7[%c0_13, %c0_14] : memref<16x33xbf16, #tpu.memory_space<vmem>>, vector<16x33xbf16>
    %46 = arith.truncf %44 : vector<33x640xf32> to vector<33x640xbf16>
    %cst_15 = arith.constant dense<0.000000e+00> : vector<16x640xf32>
    %47 = tpu.matmul %45, %46, %cst_15 {dimension_numbers = #tpu.dot_dimension_numbers<[1], [0], [0], [1], [0, 0, 1, 1], [], []>} : vector<16x33xbf16>, vector<33x640xbf16>, vector<16x640xf32> -> vector<16x640xf32>
    %c0_16 = arith.constant 0 : index
    %c0_17 = arith.constant 0 : index
    %48 = vector.load %arg8[%c0_16, %c0_17] : memref<16x128xf32, #tpu.memory_space<vmem>>, vector<16x128xf32>
    %49 = vector.extract_strided_slice %48 {offsets = [0, 0], sizes = [16, 1], strides = [1, 1]} : vector<16x128xf32> to vector<16x1xf32>
    %50 = vector.broadcast %49 : vector<16x1xf32> to vector<16x640xf32>
    %51 = arith.addf %47, %50 : vector<16x640xf32>
    %cst_18 = arith.constant 0.000000e+00 : f32
    %52 = vector.broadcast %cst_18 : f32 to vector<16x640xf32>
    %53 = arith.maximumf %51, %52 : vector<16x640xf32>
    %c0_19 = arith.constant 0 : index
    %c0_20 = arith.constant 0 : index
    %54 = vector.load %arg9[%c0_19, %c0_20] : memref<3x16xbf16, #tpu.memory_space<vmem>>, vector<3x16xbf16>
    %55 = arith.truncf %53 : vector<16x640xf32> to vector<16x640xbf16>
    %cst_21 = arith.constant dense<0.000000e+00> : vector<3x640xf32>
    %56 = tpu.matmul %54, %55, %cst_21 {dimension_numbers = #tpu.dot_dimension_numbers<[1], [0], [0], [1], [0, 0, 1, 1], [], []>} : vector<3x16xbf16>, vector<16x640xbf16>, vector<3x640xf32> -> vector<3x640xf32>
    %c0_22 = arith.constant 0 : index
    %c0_23 = arith.constant 0 : index
    %57 = vector.load %arg10[%c0_22, %c0_23] : memref<3x128xf32, #tpu.memory_space<vmem>>, vector<3x128xf32>
    %58 = vector.extract_strided_slice %57 {offsets = [0, 0], sizes = [3, 1], strides = [1, 1]} : vector<3x128xf32> to vector<3x1xf32>
    %59 = vector.broadcast %58 : vector<3x1xf32> to vector<3x640xf32>
    %60 = arith.addf %56, %59 : vector<3x640xf32>
    %61 = math.tanh %60 : vector<3x640xf32>
    %cst_24 = arith.constant 5.000000e-03 : f32
    %62 = vector.broadcast %cst_24 : f32 to vector<3x640xf32>
    %63 = arith.mulf %61, %62 : vector<3x640xf32>
    %c0_25 = arith.constant 0 : index
    %c0_26 = arith.constant 0 : index
    %c0_27 = arith.constant 0 : index
    %64 = vector.load %arg11[%c0_25, %c0_26, %c0_27] : memref<1x3x640xf32, #tpu.memory_space<vmem>>, vector<1x3x640xf32>
    %65 = vector.shape_cast %64 : vector<1x3x640xf32> to vector<3x640xf32>
    %66 = vector.shape_cast %63 : vector<3x640xf32> to vector<1x3x640xf32>
    tpu.vector_store %arg11[%c0_25, %c0_26, %c0_27], %66 {strides = array<i32>} : memref<1x3x640xf32, #tpu.memory_space<vmem>>, vector<1x3x640xf32>,
    return
  }
  func.func @transform_0(%arg0: i32, %arg1: i32) -> (i32, i32, i32) {
    %c0_i32 = arith.constant 0 : i32
    %c0_i32_0 = arith.constant 0 : i32
    return %arg0, %c0_i32, %arg1 : i32, i32, i32
  }
  func.func @transform_1(%arg0: i32, %arg1: i32) -> (i32, i32, i32) {
    %c0_i32 = arith.constant 0 : i32
    %c0_i32_0 = arith.constant 0 : i32
    %c0_i32_1 = arith.constant 0 : i32
    return %arg0, %c0_i32, %c0_i32_0 : i32, i32, i32
  }
  func.func @transform_2(%arg0: i32, %arg1: i32) -> (i32, i32) {
    %c0_i32 = arith.constant 0 : i32
    %c0_i32_0 = arith.constant 0 : i32
    %c0_i32_1 = arith.constant 0 : i32
    return %c0_i32, %c0_i32_0 : i32, i32
  }
  func.func @transform_3(%arg0: i32, %arg1: i32) -> (i32, i32) {
    %c0_i32 = arith.constant 0 : i32
    %c0_i32_0 = arith.constant 0 : i32
    %c0_i32_1 = arith.constant 0 : i32
    return %c0_i32, %c0_i32_0 : i32, i32
  }
  func.func @transform_4(%arg0: i32, %arg1: i32) -> (i32, i32) {
    %c0_i32 = arith.constant 0 : i32
    %c0_i32_0 = arith.constant 0 : i32
    %c0_i32_1 = arith.constant 0 : i32
    return %c0_i32, %c0_i32_0 : i32, i32
  }
  func.func @transform_5(%arg0: i32, %arg1: i32) -> (i32, i32) {
    %c0_i32 = arith.constant 0 : i32
    %c0_i32_0 = arith.constant 0 : i32
    %c0_i32_1 = arith.constant 0 : i32
    return %c0_i32, %c0_i32_0 : i32, i32
  }
  func.func @transform_6(%arg0: i32, %arg1: i32) -> (i32, i32) {
    %c0_i32 = arith.constant 0 : i32
    %c0_i32_0 = arith.constant 0 : i32
    %c0_i32_1 = arith.constant 0 : i32
    return %c0_i32, %c0_i32_0 : i32, i32
  }
  func.func @transform_7(%arg0: i32, %arg1: i32) -> (i32, i32) {
    %c0_i32 = arith.constant 0 : i32
    %c0_i32_0 = arith.constant 0 : i32
    %c0_i32_1 = arith.constant 0 : i32
    return %c0_i32, %c0_i32_0 : i32, i32
  }
  func.func @transform_8(%arg0: i32, %arg1: i32) -> (i32, i32) {
    %c0_i32 = arith.constant 0 : i32
    %c0_i32_0 = arith.constant 0 : i32
    %c0_i32_1 = arith.constant 0 : i32
    return %c0_i32, %c0_i32_0 : i32, i32
  }
  func.func @transform_9(%arg0: i32, %arg1: i32) -> (i32, i32, i32) {
    %c0_i32 = arith.constant 0 : i32
    %c0_i32_0 = arith.constant 0 : i32
    return %arg0, %c0_i32, %arg1 : i32, i32, i32
  }
}

</mosaic_0001>

<bundles_post_ra>
// kernel: tpu_custom_call.1
= control target key start
LH: loop header
LB: loop body
LE: loop exit
PB: predicated region body
PF: predicated region fallthrough
CT: control target
= control target key end

     0   :  { %s2085_s30 = smov 0   ;;  %s2087_s10 = smov 0   ;;  %s2800_s0 = inlined_call_operand.vmem [shape: f32[2,3,640], index: 0, kind: input, shape index: {}]   ;;  %s2801_s1 = inlined_call_operand.vmem [shape: f32[2,67,128], index: 1, kind: input, shape index: {}]   ;;  %s2802_s2 = inlined_call_operand.vmem [shape: f32[67,128], index: 2, kind: input, shape index: {}]   ;;  %s2803_s3 = inlined_call_operand.vmem [shape: bf16[33,67], index: 3, kind: input, shape index: {}]   ;;  %s2804_s4 = inlined_call_operand.vmem [shape: f32[33,128], index: 4, kind: input, shape index: {}]   ;;  %s2805_s5 = inlined_call_operand.vmem [shape: bf16[16,33], index: 5, kind: input, shape index: {}]   ;;  %s2806_s6 = inlined_call_operand.vmem [shape: f32[16,128], index: 6, kind: input, shape index: {}]   ;;  %s2807_s7 = inlined_call_operand.vmem [shape: bf16[3,16], index: 7, kind: input, shape index: {}]   ;;  %s2808_s8 = inlined_call_operand.vmem [shape: f32[3,128], index: 8, kind: input, shape index: {}]   ;;  %s2809_s9 = inlined_call_operand.vmem [shape: f32[2,3,640], index: 9, kind: output, shape index: {}]  }
   0x1   :  { %s2089_s11 = smov 0  }
   0x2 LB: > { %s31_s12 = sadd.s32 1, %s2023_s10  ;;  %p1851_p0 = scmp.ge.s32.totalorder %s2027_s11, 1  ;;  %s2027_s11 = sphi %s2089_s11, %s19_s11   ;;  %s2023_s10 = sphi %s2087_s10, %s2832_s10   ;;  %s2019_s30 = sphi %s2085_s30, %s2831_s30  }
   0x3   : > { %p33_p1 = scmp.ge.s32.totalorder %s31_s12, 2  ;;  %p318_p2 = scmp.lt.s32.totalorder %s2027_s11, 3 }
   0x5   : > { %s2834_s12 = smov (%p33_p1, %s31_s12), 0  ;;  %p319_p3 = pnand %p1851_p0, %p318_p2 }
   0x7   : > { %322 = sbr.rel (%p319_p3) target bundleno = 973 (0x3cd), region = 56 }
   0xe   : > { %v2106_v0 = vld [vmem:[%s2802_s2 + $0x20] sm:$0xff]  ;;  %v2029_v2 = vmov 1   ;;  %p368_p4 = scmp.lt.s32.totalorder %s2019_s30, 1  ;;  %v2117_v3 = vld [vmem:[%s2802_s2 + $0x38] sm:$0xff]  ;;  %v454_v4 = vld [vmem:[%s2802_s2 + $0x8] sm:$0xff]  ;;  %v2810_v5 = vmov 0   ;;  %v519_v17 = vlaneseq }
   0xf   : > { %v453_v1 = vld [vmem:[%s2802_s2] sm:$0xff]  ;;  %1972 = vset.pattern.permute.xlu0 %v2029_v2  ;;  %1966 = vset.pattern.permute.xlu1 %v2029_v2  ;;  %v2031_v7 = vmov 2   ;;  %v455_v9 = vld [vmem:[%s2802_s2 + $0x10] sm:$0xff]  ;;  %v458_v11 = vld [vmem:[%s2802_s2 + $0x28] sm:$0xff]  ;;  %vm1175_vm0 = vcmask 1040384   ;;  %vm1176_vm1 = vcmask 1041408  }
  0x10   : > { %626 = vperm.xlu0 %1972, %v2106_v0   ;;  %610 = vperm.xlu1 %1966, %v453_v1   ;;  %s2836_s30 = smov (!%p368_p4, %s2019_s30), 1  ;;  %v459_v14 = vld [vmem:[%s2802_s2 + $0x30] sm:$0xff]  ;;  %v456_v16 = vld [vmem:[%s2802_s2 + $0x18] sm:$0xff]  ;;  %v2161_v19 = vshrl.u32 %v519_v17, 7  ;;  %v1122_v38 = vld [vmem:[%s2804_s4] sm:$0xff]  ;;  %vm1165_vm2 = vcmask 547840  }
  0x11   : > { %1226 = vmatprep.mubr.bf16.mxu0 %v2810_v5  ;;  %1287 = vmatprep.mubr.bf16.mxu1 %v2810_v5  ;;  %s1934_s21 = smul.u32 20, %s2836_s30  ;;  %v1124_v40 = vld [vmem:[%s2804_s4 + $0x10] sm:$0xff]  ;;  %v1126_v42 = vld [vmem:[%s2804_s4 + $0x20] sm:$0x1]  ;;  %v1415_v43 = vld [vmem:[%s2806_s6 + $0x8] sm:$0xff]  ;;  %vm2034_vm3 = vmmov 0  }
  0x12   : > { %s1935_s16 = smul.u32 72, %s2836_s30  ;;  %v2165_v21 = vsub.s32 0, %v2161_v19  ;;  %v2168_v22 = vsub.s32 1, %v2161_v19  ;;  %v2171_v23 = vsub.s32 2, %v2161_v19  ;;  %v461_v44 = vld [vmem:[%s2802_s2 + $0x40] sm:$0x7] }
  0x13   : > { %s2133_s24 = scalar_lea.vmem %s2800_s0, %s1934_s21  ;;  %v1123_v48 = vld [vmem:[%s2804_s4 + $0x8] sm:$0xff]  ;;  %v1125_v52 = vld [vmem:[%s2804_s4 + $0x18] sm:$0xff]  ;;  %v1414_v55 = vld [vmem:[%s2806_s6] sm:$0xff]  ;;  %vm1431_vm4 = vcmask 269312   ;;  %vm1601_vm5 = vcmask 130048   ;;  %s390_s20 = scalar_lea.vmem %s2809_s9, %s1934_s21 }
  0x14   : > { %638 = vperm.xlu0 %1972, %v2117_v3   ;;  %614 = vperm.xlu1 %1966, %v454_v4   ;;  %v395_v6 = vld [vmem:[%s2133_s24 + $0x10] sm:$0x7]  ;;  %s2158_s19 = scalar_lea.vmem %s2801_s1, %s1935_s16  ;;  %v393_v49 = vld [vmem:[%s2133_s24] sm:$0x77]  ;;  %v394_v50 = vld [vmem:[%s2133_s24 + $0x8] sm:$0x77] }
  0x15   : > { %v398_v8 = vmul.f32 %v395_v6, %v395_v6  ;;  %v462_v18 = vld [vmem:[%s2158_s19] sm:$0xff]  ;;  %v463_v24 = vld [vmem:[%s2158_s19 + $0x8] sm:$0xff]  ;;  %v469_v37 = vld [vmem:[%s2158_s19 + $0x38] sm:$0xff]  ;;  %v396_v51 = vmul.f32 %v393_v49, %v393_v49  ;;  %v397_v53 = vmul.f32 %v394_v50, %v394_v50 }
  0x16   : > { %v467_v36 = vld [vmem:[%s2158_s19 + $0x28] sm:$0xff]  ;;  %v464_v39 = vld [vmem:[%s2158_s19 + $0x10] sm:$0xff]  ;;  %v465_v41 = vld [vmem:[%s2158_s19 + $0x18] sm:$0xff] }
  0x17   : > { %v1857_v10 = vrot.slane %v398_v8, 9  ;;  %v1860_v13 = vrot.slane %v398_v8, 10  ;;  %v466_v45 = vld [vmem:[%s2158_s19 + $0x20] sm:$0xff]  ;;  %v468_v46 = vld [vmem:[%s2158_s19 + $0x30] sm:$0xff]  ;;  %v1855_v54 = vrot.slane %v396_v51, 9  ;;  %v1856_v56 = vrot.slane %v397_v53, 9 }
  0x18   : > { %1977 = vset.pattern.permute.xlu0 %v2031_v7  ;;  %1967 = vset.pattern.permute.xlu1 %v2031_v7  ;;  %v470_v47 = vld [vmem:[%s2158_s19 + $0x40] sm:$0x7]  ;;  %v1858_v58 = vrot.slane %v396_v51, 10  ;;  %v1859_v61 = vrot.slane %v397_v53, 10 }
  0x19   : > { %784 = vperm.xlu0 %1977, %v453_v1   ;;  %788 = vperm.xlu1 %1967, %v454_v4   ;;  %v413_v12 = vadd.f32 %v1857_v10, %v398_v8  ;;  %v411_v57 = vadd.f32 %v1855_v54, %v396_v51  ;;  %v1595_v59 = vld [vmem:[%s2808_s8] sm:$0x7]  ;;  %v412_v60 = vadd.f32 %v1856_v56, %v397_v53 }
  0x1b   : > { %v425_v15 = vadd.f32 %v1860_v13, %v413_v12  ;;  %v423_v62 = vadd.f32 %v1858_v58, %v411_v57  ;;  %v424_v63 = vadd.f32 %v1859_v61, %v412_v60 }
  0x1d   : > { %792 = vperm.xlu0 %1977, %v455_v9   ;;  %1968 = vset.pattern.permute.xlu1 %v2810_v5  ;;  %1989 = vrsqrt.f32 %v425_v15 }
  0x1e   : > { %483 = vperm.xlu1 %1968, %v455_v9   ;;  %1991 = vrsqrt.f32 %v423_v62 }
  0x1f   : > { %1993 = vrsqrt.f32 %v424_v63 }
  0x21   : > { %804 = vperm.xlu0 %1977, %v458_v11  }
  0x22   : > { %1969 = vset.pattern.permute.xlu1 %v2029_v2 }
  0x23   : > { %618 = vperm.xlu1 %1969, %v455_v9  }
  0x25   : > { %808 = vperm.xlu0 %1977, %v459_v14  }
  0x27   : > { %622 = vperm.xlu1 %1969, %v456_v16   ;;  %v1990_v20 = vpop.eup %1989 }
  0x28   : > { %v437_v25 = vrot.slane %v1990_v20, 7  ;;  %v446_v26 = vrot.slane %v1990_v20, 6  ;;  %v431_v27 = vmul.f32 %v1990_v20, %v395_v6  ;;  %v1992_v9 = vpop.eup %1991 }
  0x29   : > { %1980 = vset.pattern.permute.xlu0 %v2810_v5  ;;  %v1994_v10 = vpop.eup %1993  ;;  %v435_v15 = vrot.slane %v1992_v9, 7 }
  0x2a   : > { %473 = vperm.xlu0 %1980, %v453_v1   ;;  %v443_v28 = vmul.f32 %v437_v25, %v395_v6  ;;  %v452_v29 = vmul.f32 %v446_v26, %v395_v6  ;;  %v538_v30 = vrot.slane %v431_v27, %v2165_v21  ;;  %v445_v20 = vrot.slane %v1994_v10, 6 }
  0x2b   : > { %1970 = vset.pattern.permute.xlu1 %v2031_v7  ;;  %v441_v25 = vmul.f32 %v435_v15, %v393_v49 }
  0x2c   : > { %796 = vperm.xlu1 %1970, %v456_v16   ;;  %v667_v31 = vrot.slane %v443_v28, %v2168_v22  ;;  %v841_v32 = vrot.slane %v452_v29, %v2171_v23  ;;  %v2179_v33 = vrot.slane %v538_v30, %v2165_v21  ;;  %v525_v28 = vsub.s32 4, %v2161_v19 }
  0x2d   : > { %v654_v29 = vsub.s32 5, %v2161_v19  ;;  %v429_v30 = vmul.f32 %v1992_v9, %v393_v49 }
  0x2e   : > { %478 = vperm.xlu0 %1980, %v454_v4   ;;  %v2182_v34 = vrot.slane %v667_v31, %v2168_v22  ;;  %v2185_v35 = vrot.slane %v841_v32, %v2171_v23  ;;  %v430_v32 = vmul.f32 %v1994_v10, %v394_v50 }
  0x30   : > { %1971 = vset.pattern.permute.xlu1 %v2810_v5 }
  0x31   : > { %959 = vperm.xlu1 %1971, %v462_v18   ;;  %v444_v18 = vrot.slane %v1992_v9, 6 }
  0x32   : > { %488 = vperm.xlu0 %1980, %v456_v16   ;;  %v436_v16 = vrot.slane %v1994_v10, 7 }
  0x34   : > { %v442_v26 = vmul.f32 %v436_v16, %v394_v50 }
  0x35   : > { %493 = vperm.xlu1 %1971, %v2106_v0  }
  0x36   : > { %964 = vperm.xlu0 %1980, %v463_v24  }
  0x39   : > { %498 = vperm.xlu1 %1971, %v458_v11  }
  0x3a   : > { %503 = vperm.xlu0 %1980, %v459_v14  }
  0x3d   : > { %1973 = vset.pattern.permute.xlu1 %v2029_v2 }
  0x3e   : > { %630 = vperm.xlu1 %1973, %v458_v11   ;;  %984 = vperm.xlu0 %1980, %v467_v36  }
  0x42   : > { %1974 = vset.pattern.permute.xlu1 %v2031_v7  ;;  %994 = vperm.xlu0 %1980, %v469_v37   ;;  %v828_v37 = vsub.s32 6, %v2161_v19  ;;  %v534_v19 = vrot.slane %v430_v32, %v525_v28 }
  0x43   : > { %800 = vperm.xlu1 %1974, %v2106_v0  }
  0x44   : > { %v2329_v10 = vrot.slane %v534_v19, %v2165_v21 }
  0x46   : > { %1129 = vperm.xlu0 %1980, %v1122_v38   ;;  %v450_v38 = vmul.f32 %v444_v18, %v393_v49 }
  0x47   : > { %1975 = vset.pattern.permute.xlu1 %v2810_v5 }
  0x48   : > { %969 = vperm.xlu1 %1975, %v464_v39   ;;  %v451_v39 = vmul.f32 %v445_v20, %v394_v50  ;;  %v825_v51 = vrot.slane %v450_v38, %v2171_v23 }
  0x4a   : > { %1139 = vperm.xlu0 %1980, %v1124_v40   ;;  %v651_v40 = vrot.slane %v441_v25, %v2168_v22  ;;  %v833_v53 = vrot.slane %v451_v39, %v2171_v23  ;;  %v837_v54 = vrot.slane %v451_v39, %v828_v37  ;;  %v2336_v18 = vrot.slane %v825_v51, %v2171_v23 }
  0x4c   : > { %974 = vperm.xlu1 %1975, %v465_v41   ;;  %v659_v41 = vrot.slane %v442_v26, %v2168_v22 }
  0x4e   : > { %1149 = vperm.xlu0 %1980, %v1126_v42   ;;  %v2305_v56 = vrot.slane %v659_v41, %v2168_v22 }
  0x50   : > { %508 = vperm.xlu1 %1975, %v2117_v3  }
  0x52   : > { %1423 = vperm.xlu0 %1980, %v1415_v43  }
  0x54   : > { %1976 = vset.pattern.permute.xlu1 %v2029_v2 }
  0x55   : > { %634 = vperm.xlu1 %1976, %v459_v14  }
  0x59   : > { %1978 = vset.pattern.permute.xlu1 %v2810_v5 }
  0x5a   : > { %513 = vperm.xlu1 %1978, %v461_v44  }
  0x5e   : > { %1979 = vset.pattern.permute.xlu1 %v2029_v2 }
  0x5f   : > { %642 = vperm.xlu1 %1979, %v461_v44  }
  0x63   : > { %1981 = vset.pattern.permute.xlu1 %v2031_v7 }
  0x64   : > { %812 = vperm.xlu1 %1981, %v2117_v3  }
  0x68   : > { %1982 = vset.pattern.permute.xlu1 %v2810_v5 }
  0x69   : > { %979 = vperm.xlu1 %1982, %v466_v45   ;;  %v526_v45 = vrot.slane %v429_v30, %v525_v28 }
  0x6b   : > { %v2317_v61 = vrot.slane %v526_v45, %v2165_v21 }
  0x6d   : > { %1983 = vset.pattern.permute.xlu1 %v2031_v7 }
  0x6e   : > { %816 = vperm.xlu1 %1983, %v461_v44   ;;  %v522_v44 = vrot.slane %v429_v30, %v2165_v21 }
  0x70   : > { %v2314_v60 = vrot.slane %v522_v44, %v2165_v21 }
  0x72   : > { %1984 = vset.pattern.permute.xlu1 %v2810_v5 }
  0x73   : > { %989 = vperm.xlu1 %1984, %v468_v46   ;;  %v655_v46 = vrot.slane %v441_v25, %v654_v29  ;;  %v2345_v25 = vrot.slane %v837_v54, %v2171_v23 }
  0x75   : > { %v2320_v62 = vrot.slane %v655_v46, %v2168_v22 }
  0x77   : > { %999 = vperm.xlu1 %1984, %v470_v47   ;;  %v663_v47 = vrot.slane %v442_v26, %v654_v29 }
  0x79   : > { %v2323_v63 = vrot.slane %v663_v47, %v2168_v22 }
  0x7b   : > { %1134 = vperm.xlu1 %1984, %v1123_v48   ;;  %v530_v48 = vrot.slane %v430_v32, %v2165_v21 }
  0x7d   : > { %v2326_v9 = vrot.slane %v530_v48, %v2165_v21 }
  0x7f   : > { %1144 = vperm.xlu1 %1984, %v1125_v52   ;;  %v829_v52 = vrot.slane %v450_v38, %v828_v37 }
  0x81   : > { %v2339_v20 = vrot.slane %v829_v52, %v2171_v23 }
  0x83   : > { %1418 = vperm.xlu1 %1984, %v1414_v55   ;;  %v2302_v55 = vrot.slane %v651_v40, %v2168_v22  ;;  %v2342_v22 = vrot.slane %v833_v53, %v2171_v23 }
  0x87   : > { %1598 = vperm.xlu1 %1984, %v1595_v59  }
  0x8f   : > { %v2236_v0 = vpop.permute.xlu1 %610  ;;  %v2238_v1 = vpop.permute.xlu0 %626 }
  0x90   : > { %v2242_v2 = vmul.f32 %v2182_v34, %v2236_v0  ;;  %v2246_v3 = vmul.f32 %v2182_v34, %v2238_v1  ;;  %v693_v21 = vmul.f32 %v2302_v55, %v2236_v0  ;;  %v696_v37 = vmul.f32 %v2323_v63, %v2236_v0 }
  0x91   : > { %v2364_v38 = vmul.f32 %v2302_v55, %v2238_v1  ;;  %v2368_v39 = vmul.f32 %v2320_v62, %v2238_v1  ;;  %v2380_v48 = vmul.f32 %v2305_v56, %v2238_v1  ;;  %v2400_v5 = vmul.f32 %v2323_v63, %v2238_v1 }
  0x93   : > { %v2248_v4 = vpop.permute.xlu1 %614  ;;  %v2250_v6 = vpop.permute.xlu0 %638  ;;  %2814 = vst [vmem:[#allocation4_spill] sm:$0xff] %v2364_v38  ;;  %2815 = vst [vmem:[#allocation5_spill] sm:$0xff] %v2368_v39 }
  0x94   : > { %v2254_v7 = vmul.f32 %v2182_v34, %v2248_v4  ;;  %v2258_v8 = vmul.f32 %v2182_v34, %v2250_v6  ;;  %2816 = vst [vmem:[#allocation6_spill] sm:$0xff] %v2380_v48  ;;  %v701_v54 = vmul.f32 %v2323_v63, %v2248_v4  ;;  %2817 = vst [vmem:[#allocation7_spill] sm:$0xff] %v2400_v5 }
  0x95   : > { %v698_v48 = vmul.f32 %v2302_v55, %v2248_v4  ;;  %v700_v1 = vmul.f32 %v2305_v56, %v2248_v4 }
  0x96   : > { %2812 = vst [vmem:[#allocation2_spill] sm:$0xff] %v2258_v8 }
  0x98   : > { %v2260_v11 = vpop.permute.xlu1 %788  ;;  %v2262_v12 = vpop.permute.xlu0 %784 }
  0x99   : > { %v2266_v13 = vmul.f32 %v2185_v35, %v2260_v11  ;;  %v2270_v14 = vmul.f32 %v2185_v35, %v2262_v12  ;;  %v868_v23 = vmul.f32 %v2339_v20, %v2262_v12  ;;  %v870_v41 = vmul.f32 %v2345_v25, %v2262_v12 }
  0x9c   : > { %v2272_v17 = vpop.permute.xlu0 %792 }
  0x9d   : > { %v2274_v24 = vpop.permute.xlu1 %483  ;;  %v881_v27 = vmul.f32 %v2185_v35, %v2272_v17 }
  0x9e   : > { %v578_v31 = vmul.f32 %v2179_v33, %v2274_v24 }
  0xa0   : > { %v2282_v36 = vpop.permute.xlu0 %804 }
  0xa1   : > { %v2289_v42 = vmul.f32 %v2185_v35, %v2282_v36 }
  0xa2   : > { %v2291_v43 = vpop.permute.xlu1 %618 }
  0xa3   : > { %v707_v49 = vmul.f32 %v2182_v34, %v2291_v43 }
  0xa4   : > { %v2297_v50 = vpop.permute.xlu0 %808 }
  0xa5   : > { %v752_v57 = vadd.f32 %v707_v49, %v578_v31  ;;  %v2309_v58 = vmul.f32 %v2185_v35, %v2297_v50  ;;  %v694_v31 = vmul.f32 %v2320_v62, %v2236_v0  ;;  %v699_v49 = vmul.f32 %v2320_v62, %v2248_v4 }
  0xa6   : > { %v2311_v59 = vpop.permute.xlu1 %622  ;;  %v872_v4 = vmul.f32 %v2336_v18, %v2260_v11 }
  0xa7   : > { %2813 = vst [vmem:[#allocation3_spill] sm:$0xff] %v2309_v58  ;;  %v712_v15 = vmul.f32 %v2182_v34, %v2311_v59  ;;  %v2333_v16 = vadd.f32 %v881_v27, %v752_v57  ;;  %v695_v27 = vmul.f32 %v2305_v56, %v2236_v0 }
  0xa9   : > { %v474_v26 = vpop.permute.xlu0 %473 }
  0xaa   : > { %v568_v28 = vmul.f32 %v2179_v33, %v474_v26  ;;  %v565_v29 = vmul.f32 %v2317_v61, %v474_v26  ;;  %v567_v32 = vmul.f32 %v2329_v10, %v474_v26  ;;  %v564_v44 = vmul.f32 %v2314_v60, %v474_v26 }
  0xab   : > { %v2353_v30 = vpop.permute.xlu1 %796 }
  0xac   : > { %v742_v40 = vadd.f32 %v2242_v2, %v568_v28  ;;  %v2376_v45 = vmul.f32 %v2185_v35, %v2353_v30  ;;  %v739_v46 = vadd.f32 %v694_v31, %v565_v29  ;;  %v741_v47 = vadd.f32 %v696_v37, %v567_v32 }
  0xad   : > { %v479_v0 = vpop.permute.xlu0 %478 }
  0xae   : > { %v573_v19 = vmul.f32 %v2179_v33, %v479_v0  ;;  %v916_v2 = vadd.f32 %v2270_v14, %v742_v40  ;;  %v570_v51 = vmul.f32 %v2317_v61, %v479_v0  ;;  %v913_v52 = vadd.f32 %v868_v23, %v739_v46 }
  0xaf   : > { %v572_v53 = vmul.f32 %v2329_v10, %v479_v0  ;;  %v569_v57 = vmul.f32 %v2314_v60, %v479_v0  ;;  %v915_v31 = vadd.f32 %v870_v41, %v741_v47  ;;  %v867_v14 = vmul.f32 %v2336_v18, %v2262_v12 }
  0xb0   : > { %v747_v28 = vadd.f32 %v2254_v7, %v573_v19  ;;  %v960_v29 = vpop.permute.xlu1 %959  ;;  %v744_v40 = vadd.f32 %v699_v49, %v570_v51  ;;  %v738_v46 = vadd.f32 %v693_v21, %v564_v44  ;;  %v873_v7 = vmul.f32 %v2339_v20, %v2260_v11 }
  0xb1   : > { %v2394_v32 = vadd.f32 %v960_v29, %v916_v2  ;;  %v2396_v37 = vpop.permute.xlu0 %488  ;;  %v746_v23 = vadd.f32 %v701_v54, %v572_v53  ;;  %v875_v41 = vmul.f32 %v2345_v25, %v2260_v11  ;;  %v566_v47 = vmul.f32 %v2326_v9, %v474_v26 }
  0xb2   : > { %v583_v19 = vmul.f32 %v2179_v33, %v2396_v37  ;;  %v921_v21 = vadd.f32 %v2266_v13, %v747_v28  ;;  %v1003_v44 = vadd.f32 %v960_v29, %v913_v52  ;;  %v571_v2 = vmul.f32 %v2326_v9, %v479_v0 }
  0xb3   : > { %v918_v51 = vadd.f32 %v873_v7, %v744_v40  ;;  %v743_v53 = vadd.f32 %v698_v48, %v569_v57  ;;  %v920_v38 = vadd.f32 %v875_v41, %v746_v23  ;;  %v1005_v5 = vadd.f32 %v960_v29, %v915_v31 }
  0xb4   : > { %v2415_v49 = vpop.permute.xlu1 %493  ;;  %v757_v54 = vadd.f32 %v712_v15, %v583_v19  ;;  %v912_v26 = vadd.f32 %v867_v14, %v738_v46  ;;  %v1048_v52 = vmax.f32 %v1003_v44, 0.0  ;;  %v740_v28 = vadd.f32 %v695_v27, %v566_v47 }
  0xb5   : > { %v965_v58 = vpop.permute.xlu0 %964  ;;  %v588_v39 = vmul.f32 %v2179_v33, %v2415_v49  ;;  %v869_v48 = vmul.f32 %v2342_v22, %v2262_v12  ;;  %v917_v14 = vadd.f32 %v872_v4, %v743_v53  ;;  %v745_v40 = vadd.f32 %v700_v1, %v571_v2 }
  0xb6   : > { %v2419_v8 = vadd.f32 %v965_v58, %v921_v21  ;;  %v1008_v13 = vadd.f32 %v965_v58, %v918_v51  ;;  %v1010_v0 = vadd.f32 %v965_v58, %v920_v38  ;;  %v2432_v23 = vmul.f32 %v2302_v55, %v2250_v6 }
  0xb7   : > { %v2426_v15 = vadd.f32 %v2246_v3, %v588_v39  ;;  %v1050_v46 = vmax.f32 %v1005_v5, 0.0  ;;  %v1002_v7 = vadd.f32 %v960_v29, %v912_v26  ;;  %v874_v27 = vmul.f32 %v2342_v22, %v2260_v11 }
  0xb8   : > { %v2428_v57 = vpop.permute.xlu1 %498  ;;  %v1053_v31 = vmax.f32 %v1008_v13, 0.0  ;;  %2818 = vst [vmem:[#allocation8_spill] sm:$0xff] %v2432_v23  ;;  %v1055_v3 = vmax.f32 %v1010_v0, 0.0  ;;  %v1007_v39 = vadd.f32 %v965_v58, %v917_v14  ;;  %v2440_v41 = vmul.f32 %v2320_v62, %v2250_v6 }
  0xb9   : > { %v593_v12 = vmul.f32 %v2179_v33, %v2428_v57  ;;  %v2444_v47 = vmul.f32 %v2305_v56, %v2250_v6  ;;  %v914_v19 = vadd.f32 %v869_v48, %v740_v28  ;;  %v919_v5 = vadd.f32 %v874_v27, %v745_v40 }
  0xba   : > { %v1098_v38 = vpack.c.bf16 %v1053_v31, %v1048_v52  ;;  %v2448_v21 = vmul.f32 %v2323_v63, %v2250_v6  ;;  %v877_v11 = vmul.f32 %v2336_v18, %v2272_v17  ;;  %v1100_v44 = vpack.c.bf16 %v1055_v3, %v1050_v46 }
  0xbb   : > { %2819 = vst [vmem:[#allocation9_spill] sm:$0xff] %v2444_v47  ;;  %v1052_v1 = vmax.f32 %v1007_v39, 0.0  ;;  %v878_v2 = vmul.f32 %v2339_v20, %v2272_v17  ;;  %v1047_v53 = vmax.f32 %v1002_v7, 0.0  ;;  %v1004_v26 = vadd.f32 %v960_v29, %v914_v19 }
  0xbc   : > { %1194 = vmatprep.subr.bf16.mxu0 %v1098_v38  ;;  %v1009_v13 = vadd.f32 %v965_v58, %v919_v5  ;;  %v879_v4 = vmul.f32 %v2342_v22, %v2272_v17  ;;  %v880_v6 = vmul.f32 %v2345_v25, %v2272_v17  ;;  %v704_v52 = vmul.f32 %v2320_v62, %v2291_v43 }
  0xbd   : > { %v2454_v51 = vpop.permute.xlu1 %630  ;;  %v706_v0 = vmul.f32 %v2323_v63, %v2291_v43  ;;  %1255 = vmatprep.subr.bf16.mxu1 %v1100_v44  ;;  %v1097_v48 = vpack.c.bf16 %v1052_v1, %v1047_v53  ;;  %v1049_v31 = vmax.f32 %v1004_v26, 0.0  ;;  %v574_v58 = vmul.f32 %v2314_v60, %v2274_v24 }
  0xbe   : > { %v722_v28 = vmul.f32 %v2182_v34, %v2454_v51  ;;  %v1054_v29 = vmax.f32 %v1009_v13, 0.0  ;;  %v575_v14 = vmul.f32 %v2317_v61, %v2274_v24  ;;  %v577_v17 = vmul.f32 %v2329_v10, %v2274_v24 }
  0xbf   : > { %v931_v40 = vadd.f32 %v2376_v45, %v757_v54  ;;  %v703_v46 = vmul.f32 %v2302_v55, %v2291_v43  ;;  %v705_v7 = vmul.f32 %v2305_v56, %v2291_v43  ;;  %1195 = vmatpush1.bf16.msra.mxu0 %v1097_v48  ;;  %v576_v3 = vmul.f32 %v2326_v9, %v2274_v24 }
  0xc0   : > { %v767_v27 = vadd.f32 %v722_v28, %v593_v12  ;;  %v1099_v38 = vpack.c.bf16 %v1054_v29, %v1049_v31  ;;  %v579_v39 = vmul.f32 %v2314_v60, %v2396_v37  ;;  %v580_v19 = vmul.f32 %v2317_v61, %v2396_v37 }
  0xc1   : > { %v582_v45 = vmul.f32 %v2329_v10, %v2396_v37  ;;  %v708_v43 = vmul.f32 %v2302_v55, %v2311_v59  ;;  %v581_v12 = vmul.f32 %v2326_v9, %v2396_v37  ;;  %v749_v5 = vadd.f32 %v704_v52, %v575_v14 }
  0xc2   : > { %v2485_v54 = vpop.permute.xlu1 %800  ;;  %1256 = vmatpush1.bf16.msra.mxu1 %v1099_v38  ;;  %v751_v24 = vadd.f32 %v706_v0, %v577_v17  ;;  %v709_v44 = vmul.f32 %v2320_v62, %v2311_v59  ;;  %v711_v1 = vmul.f32 %v2323_v63, %v2311_v59  ;;  %v2498_v26 = vadd.f32 %v2289_v42, %v767_v27 }
  0xc3   : > { %v891_v53 = vmul.f32 %v2185_v35, %v2485_v54  ;;  %v2502_v13 = vmul.f32 %v2336_v18, %v2282_v36  ;;  %v710_v37 = vmul.f32 %v2305_v56, %v2311_v59  ;;  %v748_v52 = vadd.f32 %v703_v46, %v574_v58 }
  0xc4   : > { %v750_v0 = vadd.f32 %v705_v7, %v576_v3  ;;  %v754_v28 = vadd.f32 %v709_v44, %v580_v19  ;;  %v756_v48 = vadd.f32 %v711_v1, %v582_v45  ;;  %v753_v31 = vadd.f32 %v708_v43, %v579_v39 }
  0xc5   : > { %v2507_v29 = vadd.f32 %v891_v53, %v2426_v15  ;;  %v2511_v14 = vmul.f32 %v2339_v20, %v2282_v36  ;;  %v2515_v42 = vmul.f32 %v2342_v22, %v2282_v36  ;;  %v923_v27 = vadd.f32 %v878_v2, %v749_v5 }
  0xc6   : > { %v755_v38 = vadd.f32 %v710_v37, %v581_v12  ;;  %v882_v59 = vmul.f32 %v2336_v18, %v2353_v30  ;;  %v883_v58 = vmul.f32 %v2339_v20, %v2353_v30  ;;  %v885_v15 = vmul.f32 %v2345_v25, %v2353_v30 }
  0xc7   : > { %2820 = vst [vmem:[#allocation10_spill] sm:$0xff] %v2507_v29  ;;  %v970_v17 = vpop.permute.xlu1 %969  ;;  %v925_v46 = vadd.f32 %v880_v6, %v751_v24  ;;  %v884_v7 = vmul.f32 %v2342_v22, %v2353_v30  ;;  %v1056_v3 = vmax.f32 %v2419_v8, 0.0  ;;  %v922_v39 = vadd.f32 %v877_v11, %v748_v52 }
  0xc8   : > { %v924_v19 = vadd.f32 %v879_v4, %v750_v0  ;;  %v928_v45 = vadd.f32 %v883_v58, %v754_v28  ;;  %v1013_v2 = vadd.f32 %v970_v17, %v923_v27  ;;  %v930_v43 = vadd.f32 %v885_v15, %v756_v48 }
  0xc9   : > { %v927_v12 = vadd.f32 %v882_v59, %v753_v31  ;;  %v1015_v44 = vadd.f32 %v970_v17, %v925_v46  ;;  %v1012_v1 = vadd.f32 %v970_v17, %v922_v39  ;;  %v929_v53 = vadd.f32 %v884_v7, %v755_v38 }
  0xca   : > { %v1014_v37 = vadd.f32 %v970_v17, %v924_v19  ;;  %v895_v30 = vmul.f32 %v2345_v25, %v2282_v36  ;;  %v1051_v8 = vmax.f32 %v2394_v32, 0.0  ;;  %v1016_v11 = vadd.f32 %v970_v17, %v2333_v16  ;;  %v504_v17 = vpop.permute.xlu0 %503 }
  0xcb   : > { %v975_v5 = vpop.permute.xlu1 %974  ;;  %v1058_v24 = vmax.f32 %v1013_v2, 0.0  ;;  %v1060_v31 = vmax.f32 %v1015_v44, 0.0  ;;  %v1057_v27 = vmax.f32 %v1012_v1, 0.0  ;;  %v2536_v59 = vmul.f32 %v2336_v18, %v2297_v50 }
  0xcc   : > { %v1021_v29 = vadd.f32 %v975_v5, %v931_v40  ;;  %v1018_v47 = vadd.f32 %v975_v5, %v928_v45  ;;  %v1020_v23 = vadd.f32 %v975_v5, %v930_v43  ;;  %v1017_v6 = vadd.f32 %v975_v5, %v927_v12  ;;  %v2821_v45 = vld [vmem:[#allocation2_spill] sm:$0xff] }
  0xcd   : > { %v1019_v4 = vadd.f32 %v975_v5, %v929_v53  ;;  %v2532_v38 = vpack.c.bf16 %v1056_v3, %v1051_v8  ;;  %v719_v36 = vmul.f32 %v2320_v62, %v2454_v51  ;;  %v1059_v32 = vmax.f32 %v1014_v37, 0.0 }
  0xce   : > { %v1063_v52 = vmax.f32 %v1018_v47, 0.0  ;;  %v1065_v0 = vmax.f32 %v1020_v23, 0.0  ;;  %v1062_v28 = vmax.f32 %v1017_v6, 0.0  ;;  %v1066_v16 = vmax.f32 %v1021_v29, 0.0 }
  0xcf   : > { %v2530_v48 = vpop.permute.xlu1 %508  ;;  %v1064_v40 = vmax.f32 %v1019_v4, 0.0  ;;  %v590_v46 = vmul.f32 %v2317_v61, %v2428_v57  ;;  %v721_v7 = vmul.f32 %v2323_v63, %v2454_v51  ;;  %v1061_v3 = vmax.f32 %v1016_v11, 0.0 }
  0xd0   : > { %v603_v23 = vmul.f32 %v2179_v33, %v2530_v48  ;;  %v1103_v47 = vpack.c.bf16 %v1063_v52, %v1058_v24  ;;  %v1105_v58 = vpack.c.bf16 %v1065_v0, %v1060_v31  ;;  %v1102_v15 = vpack.c.bf16 %v1062_v28, %v1057_v27  ;;  %v985_v28 = vpop.permute.xlu0 %984 }
  0xd1   : > { %v1104_v39 = vpack.c.bf16 %v1064_v40, %v1059_v32  ;;  %v592_v19 = vmul.f32 %v2329_v10, %v2428_v57  ;;  %v598_v29 = vmul.f32 %v2179_v33, %v504_v17  ;;  %v718_v43 = vmul.f32 %v2302_v55, %v2454_v51 }
  0xd2   : > { %v2550_v2 = vadd.f32 %v2821_v45, %v603_v23  ;;  %1196 = vmatprep.subr.bf16.mxu0 %v1103_v47  ;;  %1257 = vmatprep.subr.bf16.mxu1 %v1105_v58  ;;  %v720_v12 = vmul.f32 %v2305_v56, %v2454_v51  ;;  %v2556_v44 = vpack.c.bf16 %v1066_v16, %v1061_v3 }
  0xd3   : > { %1197 = vmatpush1.bf16.msra.mxu0 %v1102_v15  ;;  %1258 = vmatpush1.bf16.msra.mxu1 %v1104_v39  ;;  %v2560_v1 = vmul.f32 %v2339_v20, %v2297_v50  ;;  %v2564_v53 = vmul.f32 %v2342_v22, %v2297_v50  ;;  %v2568_v37 = vmul.f32 %v2345_v25, %v2297_v50  ;;  %v2823_v39 = vld [vmem:[#allocation7_spill] sm:$0xff] }
  0xd4   : > { %v635_v5 = vpop.permute.xlu1 %634  ;;  %v764_v6 = vadd.f32 %v719_v36, %v590_v46  ;;  %v589_v51 = vmul.f32 %v2314_v60, %v2428_v57  ;;  %v591_v8 = vmul.f32 %v2326_v9, %v2428_v57  ;;  %v766_v4 = vadd.f32 %v721_v7, %v592_v19  ;;  %v2822_v7 = vld [vmem:[#allocation5_spill] sm:$0xff] }
  0xd5   : > { %v727_v11 = vmul.f32 %v2182_v34, %v635_v5  ;;  %v584_v24 = vmul.f32 %v2314_v60, %v2415_v49  ;;  %v585_v52 = vmul.f32 %v2317_v61, %v2415_v49  ;;  %v586_v50 = vmul.f32 %v2326_v9, %v2415_v49 }
  0xd6   : > { %v587_v0 = vmul.f32 %v2329_v10, %v2415_v49  ;;  %v594_v31 = vmul.f32 %v2314_v60, %v504_v17  ;;  %v763_v57 = vadd.f32 %v718_v43, %v589_v51  ;;  %v765_v40 = vadd.f32 %v720_v12, %v591_v8  ;;  %v2825_v43 = vld [vmem:[#allocation3_spill] sm:$0xff] }
  0xd7   : > { %v772_v27 = vadd.f32 %v727_v11, %v598_v29  ;;  %v887_v36 = vmul.f32 %v2336_v18, %v2485_v54  ;;  %v888_v16 = vmul.f32 %v2339_v20, %v2485_v54  ;;  %v890_v32 = vmul.f32 %v2345_v25, %v2485_v54  ;;  %v2824_v29 = vld [vmem:[#allocation4_spill] sm:$0xff] }
  0xd8   : > { %v938_v47 = vadd.f32 %v2511_v14, %v764_v6  ;;  %v595_v49 = vmul.f32 %v2317_v61, %v504_v17  ;;  %v596_v58 = vmul.f32 %v2326_v9, %v504_v17  ;;  %v2596_v15 = vadd.f32 %v985_v28, %v2498_v26 }
  0xd9   : > { %v2590_v23 = vpop.permute.xlu1 %513  ;;  %v940_v46 = vadd.f32 %v895_v30, %v766_v4  ;;  %v759_v3 = vadd.f32 %v2822_v7, %v585_v52  ;;  %v761_v19 = vadd.f32 %v2823_v39, %v587_v0  ;;  %v758_v45 = vadd.f32 %v2824_v29, %v584_v24 }
  0xda   : > { %v2602_v12 = vadd.f32 %v2825_v43, %v772_v27  ;;  %v597_v51 = vmul.f32 %v2329_v10, %v504_v17  ;;  %v889_v14 = vmul.f32 %v2342_v22, %v2485_v54  ;;  %v937_v6 = vadd.f32 %v2502_v13, %v763_v57  ;;  %v2826_v17 = vld [vmem:[#allocation6_spill] sm:$0xff] }
  0xdb   : > { %v939_v26 = vadd.f32 %v2515_v42, %v765_v40  ;;  %v933_v8 = vadd.f32 %v888_v16, %v759_v3  ;;  %v2609_v30 = vadd.f32 %v985_v28, %v938_v47  ;;  %v935_v11 = vadd.f32 %v890_v32, %v761_v19 }
  0xdc   : > { %v932_v4 = vadd.f32 %v887_v36, %v758_v45  ;;  %v1076_v52 = vmax.f32 %v2596_v15, 0.0  ;;  %v724_v24 = vmul.f32 %v2320_v62, %v635_v5  ;;  %v2613_v27 = vadd.f32 %v985_v28, %v940_v46 }
  0xdd   : > { %v760_v7 = vadd.f32 %v2826_v17, %v586_v50  ;;  %v723_v54 = vmul.f32 %v2302_v55, %v635_v5  ;;  %v726_v13 = vmul.f32 %v2323_v63, %v635_v5  ;;  %v607_v42 = vmul.f32 %v2329_v10, %v2590_v23 }
  0xde   : > { %v643_v0 = vpop.permute.xlu1 %642  ;;  %v608_v40 = vmul.f32 %v2179_v33, %v2590_v23  ;;  %v1027_v16 = vadd.f32 %v985_v28, %v937_v6  ;;  %v2624_v32 = vadd.f32 %v985_v28, %v939_v26  ;;  %v599_v50 = vmul.f32 %v2314_v60, %v2530_v48 }
  0xdf   : > { %v736_v57 = vmul.f32 %v2323_v63, %v643_v0  ;;  %v737_v36 = vmul.f32 %v2182_v34, %v643_v0  ;;  %v600_v47 = vmul.f32 %v2317_v61, %v2530_v48  ;;  %v602_v46 = vmul.f32 %v2329_v10, %v2530_v48 }
  0xe0   : > { %v601_v63 = vmul.f32 %v2326_v9, %v2530_v48  ;;  %v725_v33 = vmul.f32 %v2305_v56, %v635_v5  ;;  %v769_v28 = vadd.f32 %v724_v24, %v595_v49  ;;  %v1073_v19 = vmax.f32 %v2609_v30, 0.0  ;;  %v2827_v24 = vld [vmem:[#allocation8_spill] sm:$0xff] }
  0xe1   : > { %v2632_v3 = vadd.f32 %v736_v57, %v607_v42  ;;  %v2637_v34 = vadd.f32 %v737_v36, %v608_v40  ;;  %v1075_v29 = vmax.f32 %v2613_v27, 0.0  ;;  %v771_v45 = vadd.f32 %v726_v13, %v597_v51  ;;  %v2828_v27 = vld [vmem:[#allocation9_spill] sm:$0xff] }
  0xe2   : > { %v768_v43 = vadd.f32 %v723_v54, %v594_v31  ;;  %v1072_v10 = vmax.f32 %v1027_v16, 0.0  ;;  %v934_v26 = vadd.f32 %v889_v14, %v760_v7  ;;  %v1074_v17 = vmax.f32 %v2624_v32, 0.0 }
  0xe3   : > { %v813_v39 = vpop.permute.xlu1 %812  ;;  %v774_v5 = vadd.f32 %v2440_v41, %v600_v47  ;;  %v776_v49 = vadd.f32 %v2448_v21, %v602_v46  ;;  %v773_v42 = vadd.f32 %v2827_v24, %v599_v50  ;;  %v943_v51 = vadd.f32 %v2560_v1, %v769_v28 }
  0xe4   : > { %v903_v6 = vmul.f32 %v2339_v20, %v813_v39  ;;  %v906_v48 = vmul.f32 %v2185_v35, %v813_v39  ;;  %v905_v30 = vmul.f32 %v2345_v25, %v813_v39  ;;  %v770_v31 = vadd.f32 %v725_v33, %v596_v58  ;;  %v2829_v58 = vld [vmem:[#allocation10_spill] sm:$0xff] }
  0xe5   : > { %v775_v54 = vadd.f32 %v2828_v27, %v601_v63  ;;  %v604_v14 = vmul.f32 %v2314_v60, %v2590_v23  ;;  %v945_v13 = vadd.f32 %v2568_v37, %v771_v45  ;;  %v942_v41 = vadd.f32 %v2536_v59, %v768_v43  ;;  %v995_v59 = vpop.permute.xlu0 %994 }
  0xe6   : > { %v951_v7 = vadd.f32 %v906_v48, %v2550_v2  ;;  %v733_v21 = vmul.f32 %v2302_v55, %v643_v0  ;;  %v902_v57 = vmul.f32 %v2336_v18, %v813_v39  ;;  %v904_v40 = vmul.f32 %v2342_v22, %v813_v39 }
  0xe7   : > { %v948_v1 = vadd.f32 %v903_v6, %v774_v5  ;;  %v734_v60 = vmul.f32 %v2320_v62, %v643_v0  ;;  %v735_v2 = vmul.f32 %v2305_v56, %v643_v0  ;;  %v950_v46 = vadd.f32 %v905_v30, %v776_v49 }
  0xe8   : > { %v980_v36 = vpop.permute.xlu1 %979  ;;  %v947_v43 = vadd.f32 %v902_v57, %v773_v42  ;;  %v949_v6 = vadd.f32 %v904_v40, %v775_v54  ;;  %v605_v56 = vmul.f32 %v2317_v61, %v2590_v23  ;;  %v778_v49 = vadd.f32 %v733_v21, %v604_v14 }
  0xe9   : > { %v1026_v16 = vadd.f32 %v980_v36, %v2829_v58  ;;  %v1023_v32 = vadd.f32 %v980_v36, %v933_v8  ;;  %v1025_v50 = vadd.f32 %v980_v36, %v935_v11  ;;  %v1022_v47 = vadd.f32 %v980_v36, %v932_v4 }
  0xea   : > { %v1024_v37 = vadd.f32 %v980_v36, %v934_v26  ;;  %v1038_v39 = vadd.f32 %v995_v59, %v948_v1  ;;  %v606_v4 = vmul.f32 %v2326_v9, %v2590_v23  ;;  %v944_v26 = vadd.f32 %v2564_v53, %v770_v31 }
  0xeb   : > { %v1071_v63 = vmax.f32 %v1026_v16, 0.0  ;;  %v1068_v55 = vmax.f32 %v1023_v32, 0.0  ;;  %v1070_v33 = vmax.f32 %v1025_v50, 0.0  ;;  %v1067_v28 = vmax.f32 %v1022_v47, 0.0 }
  0xec   : > { %v1069_v45 = vmax.f32 %v1024_v37, 0.0  ;;  %v1039_v61 = vadd.f32 %v995_v59, %v949_v6  ;;  %v779_v23 = vadd.f32 %v734_v60, %v605_v56  ;;  %v1041_v27 = vadd.f32 %v995_v59, %v951_v7 }
  0xed   : > { %v817_v48 = vpop.permute.xlu1 %816  ;;  %v1108_v5 = vpack.c.bf16 %v1073_v19, %v1068_v55  ;;  %v1110_v8 = vpack.c.bf16 %v1075_v29, %v1070_v33  ;;  %v1107_v11 = vpack.c.bf16 %v1072_v10, %v1067_v28  ;;  %v2663_v62 = vpack.c.bf16 %v1076_v52, %v1071_v63 }
  0xee   : > { %v910_v0 = vmul.f32 %v2345_v25, %v817_v48  ;;  %v911_v24 = vmul.f32 %v2185_v35, %v817_v48  ;;  %v1109_v19 = vpack.c.bf16 %v1074_v17, %v1069_v45  ;;  %v2032_v29 = vmov 65535  }
  0xef   : > { %1198 = vmatprep.subr.bf16.mxu0 %v1108_v5  ;;  %1259 = vmatprep.subr.bf16.mxu1 %v1110_v8  ;;  %v1177_v15 = vsel %vm1175_vm0, 4294967295, %v2032_v29  ;;  %v1040_v52 = vadd.f32 %v995_v59, %v950_v46  ;;  %v1037_v10 = vadd.f32 %v995_v59, %v947_v43  ;;  %v780_v25 = vadd.f32 %v735_v2, %v606_v4  ;;  %v1985_v4 = vld [vmem:[%s2803_s3] sm:$0xff]  }
  0xf0   : > { %1199 = vmatpush1.bf16.msra.mxu0 %v1107_v11  ;;  %v955_v9 = vadd.f32 %v910_v0, %v2632_v3  ;;  %1260 = vmatpush1.bf16.msra.mxu1 %v1109_v19  ;;  %v2675_v53 = vadd.f32 %v911_v24, %v2637_v34  ;;  %v1083_v35 = vmax.f32 %v1038_v39, 0.0  ;;  %v907_v42 = vmul.f32 %v2336_v18, %v817_v48  ;;  %v1986_v24 = vld [vmem:[%s2803_s3 + $0x8] sm:$0xff]  }
  0xf1   : > { %v908_v17 = vmul.f32 %v2339_v20, %v817_v48  ;;  %v909_v30 = vmul.f32 %v2342_v22, %v817_v48  ;;  %v1085_v57 = vmax.f32 %v1040_v52, 0.0  ;;  %v1082_v40 = vmax.f32 %v1037_v10, 0.0 }
  0xf2   : > { %v990_v31 = vpop.permute.xlu1 %989  ;;  %v1084_v1 = vmax.f32 %v1039_v61, 0.0  ;;  %v952_v47 = vadd.f32 %v907_v42, %v778_v49  ;;  %v1086_v22 = vmax.f32 %v1041_v27, 0.0  ;;  %v1178_v28 = vsel %vm1176_vm1, %v1177_v15, 0 }
  0xf3   : > { %v1036_v54 = vadd.f32 %v990_v31, %v2602_v12  ;;  %v1033_v14 = vadd.f32 %v990_v31, %v943_v51  ;;  %v1035_v21 = vadd.f32 %v990_v31, %v945_v13  ;;  %v1032_v3 = vadd.f32 %v990_v31, %v942_v41 }
  0xf4   : > { %v1034_v36 = vadd.f32 %v990_v31, %v944_v26  ;;  %v953_v20 = vadd.f32 %v908_v17, %v779_v23  ;;  %v954_v12 = vadd.f32 %v909_v30, %v780_v25  ;;  %v2033_v0 = vmov 0.0  }
  0xf5   : > { %v1081_v34 = vmax.f32 %v1036_v54, 0.0  ;;  %v1078_v58 = vmax.f32 %v1033_v14, 0.0  ;;  %v1080_v16 = vmax.f32 %v1035_v21, 0.0  ;;  %v1077_v32 = vmax.f32 %v1032_v3, 0.0 }
  0xf6   : > { %v1000_v18 = vpop.permute.xlu1 %999  ;;  %v1079_v50 = vmax.f32 %v1034_v36, 0.0  ;;  %v2830_v26 = vmov 0  }
  0xf7   : > { %v1113_v60 = vpack.c.bf16 %v1083_v35, %v1078_v58  ;;  %v1115_v7 = vpack.c.bf16 %v1085_v57, %v1080_v16  ;;  %v1112_v2 = vpack.c.bf16 %v1082_v40, %v1077_v32  ;;  %v1043_v13 = vadd.f32 %v1000_v18, %v953_v20 }
  0xf8   : > { %v1114_v51 = vpack.c.bf16 %v1084_v1, %v1079_v50  ;;  %v1045_v41 = vadd.f32 %v1000_v18, %v955_v9  ;;  %v1042_v37 = vadd.f32 %v1000_v18, %v952_v47  ;;  %v1044_v46 = vadd.f32 %v1000_v18, %v954_v12 }
  0xf9   : > { %1200 = vmatprep.subr.bf16.mxu0 %v1113_v60  ;;  %1261 = vmatprep.subr.bf16.mxu1 %v1115_v7  ;;  %v1116_v59 = vpack.c.bf16 %v1086_v22, %v1081_v34  ;;  %v1088_v63 = vmax.f32 %v1043_v13, 0.0  ;;  %v1046_v49 = vadd.f32 %v1000_v18, %v2675_v53 }
  0xfa   : > { %1201 = vmatpush1.bf16.msra.mxu0 %v1112_v2  ;;  %1262 = vmatpush1.bf16.msra.mxu1 %v1114_v51  ;;  %v1090_v55 = vmax.f32 %v1045_v41, 0.0  ;;  %v1087_v33 = vmax.f32 %v1042_v37, 0.0  ;;  %v1089_v45 = vmax.f32 %v1044_v46, 0.0  ;;  %v2725_v15 = vpop.permute.xlu1 %1134 }
  0xfb   : > { %v1118_v39 = vpack.c.bf16 %v1088_v63, %v1088_v63  ;;  %v1091_v19 = vmax.f32 %v1046_v49, 0.0 }
  0xfc   : > { %v1120_v43 = vpack.c.bf16 %v1090_v55, %v1090_v55  ;;  %v1117_v6 = vpack.c.bf16 %v1087_v33, %v1087_v33  ;;  %v1119_v48 = vpack.c.bf16 %v1089_v45, %v1089_v45 }
  0xfd   : > { %v1183_v5 = vand.u32 %v1178_v28, %v1118_v39 }
  0xfe   : > { %v1189_v8 = vand.u32 %v1178_v28, %v1120_v43  ;;  %v1180_v11 = vand.u32 %v1178_v28, %v1117_v6  ;;  %v1186_v56 = vand.u32 %v1178_v28, %v1119_v48  ;;  %v2737_v18 = vpop.permute.xlu1 %1144 }
  0xff   : > { %1202 = vmatprep.subr.bf16.mxu0 %v1183_v5 }
 0x100   : > { %1263 = vmatprep.subr.bf16.mxu1 %v1189_v8  ;;  %1203 = vmatpush1.bf16.msra.mxu0 %v1180_v11 }
 0x101   : > { %1264 = vmatpush1.bf16.msra.mxu1 %v1186_v56  ;;  %1896 = vmatprep.subr.bf16.mxu0 %v2033_v0 }
 0x103   : > { %1864 = vmatmul.mubr.msk.bf16.vlgmr.msra.gmra.mrb[0].mxu0 %vm1165_vm2, %v1985_v4 }
 0x104   : > { %1867 = vmatmul.mubr.msk.bf16.vlgmr.msra.gmra.mrb[0].mxu1 %vm1165_vm2, %v1985_v4  ;;  %1897 = vmatpush3.bf16.msra.mxu0 %v2532_v38  ;;  %v1121_v38 = vpack.c.bf16 %v1091_v19, %v1091_v19 }
 0x105   : > { %1236 = vmatprep.mubr.bf16.mxu0 %v2830_v26  ;;  %1898 = vmatprep.subr.bf16.mxu0 %v2033_v0 }
 0x106   : > { %1297 = vmatprep.mubr.bf16.mxu1 %v2830_v26  ;;  %v1192_v29 = vand.u32 %v1178_v28, %v1121_v38 }
 0x108   : > { %1899 = vmatpush3.bf16.msra.mxu0 %v2556_v44  ;;  %v1987_v44 = vld [vmem:[%s2803_s3 + $0x10] ss:$0 sps:$4 sm:$0x11]  }
 0x109   : > { %1900 = vmatprep.subr.bf16.mxu0 %v2033_v0 }
 0x10b   : > { %1865 = vmatmul.mubr.msk.bf16.gmra.mrb[4].mxu0 %vm1165_vm2, %v1986_v24 }
 0x10c   : > { %1868 = vmatmul.mubr.msk.bf16.gmra.mrb[4].mxu1 %vm1165_vm2, %v1986_v24  ;;  %1901 = vmatpush3.bf16.msra.mxu0 %v2663_v62  ;;  %v2723_v62 = vpop.permute.xlu0 %1129 }
 0x10d   : > { %1246 = vmatprep.mubr.bf16.mxu0 %v2830_v26  ;;  %1902 = vmatprep.subr.bf16.mxu0 %v2033_v0 }
 0x10e   : > { %1307 = vmatprep.mubr.bf16.mxu1 %v2830_v26 }
 0x110   : > { %1903 = vmatpush3.bf16.msra.mxu0 %v1116_v59  ;;  %v2735_v32 = vpop.permute.xlu0 %1139 }
 0x111   : > { %1904 = vmatprep.subr.bf16.mxu0 %v2033_v0 }
 0x113   : > { %1866 = vmatmul.mubr.msk.bf16.gmra.mrb[8].mxu0 %vm1165_vm2, %v1987_v44 }
 0x114   : > { %1869 = vmatmul.mubr.msk.bf16.gmra.mrb[8].mxu1 %vm1165_vm2, %v1987_v44  ;;  %1905 = vmatpush3.bf16.msra.mxu0 %v1192_v29  ;;  %v2751_v49 = vpop.permute.xlu0 %1149 }
 0x115   : > { %1906 = vmatprep.mubr.msk.bf16.mxu0 %vm2034_vm3, %v2033_v0  ;;  %1484 = vmatprep.mubr.bf16.mxu1 %v2830_v26 }
 0x116   : > { %1918 = vmatprep.subr.bf16.mxu0 %v2033_v0 }
 0x11b   : > { %1907 = vmatmul.mubr.msk.bf16.vlgmr.msra.gmra.mrb[12].mxu0 %vm1165_vm2, %v1985_v4 }
 0x11c   : > { %1910 = vmatprep.mubr.msk.bf16.mxu0 %vm2034_vm3, %v2033_v0 }
 0x123   : > { %1911 = vmatmul.mubr.msk.bf16.gmra.mrb[16].mxu0 %vm1165_vm2, %v1986_v24 }
 0x124   : > { %1914 = vmatprep.mubr.msk.bf16.mxu0 %vm2034_vm3, %v2033_v0 }
 0x12b   : > { %1915 = vmatmul.mubr.msk.bf16.gmra.mrb[20].mxu0 %vm1165_vm2, %v1987_v44 }
 0x12c   : > { %1924 = vmatprep.mubr.msk.bf16.mxu0 %vm2034_vm3, %v2033_v0 }
 0x1d6   : > { %v1228_v52 = vpop.f32.mrb[0].mxu0 }
 0x1d7   : > { %v1289_v10 = vpop.f32.mrb[0].mxu1  ;;  %v1229_v61 = vadd.f32 %v1228_v52, %v2723_v62  ;;  %v1230_v23 = vpop.f32.mrb[1].mxu0 }
 0x1d8   : > { %v1290_v9 = vadd.f32 %v1289_v10, %v2723_v62  ;;  %v1291_v25 = vpop.f32.mrb[1].mxu1  ;;  %v1231_v53 = vadd.f32 %v1230_v23, %v2723_v62  ;;  %v1232_v42 = vpop.f32.mrb[2].mxu0 }
 0x1d9   : > { %v1292_v35 = vadd.f32 %v1291_v25, %v2723_v62  ;;  %v1293_v17 = vpop.f32.mrb[2].mxu1  ;;  %v1233_v30 = vadd.f32 %v1232_v42, %v2725_v15  ;;  %v1234_v27 = vpop.f32.mrb[3].mxu0  ;;  %v1372_v3 = vmax.f32 %v1229_v61, 0.0 }
 0x1da   : > { %v1294_v31 = vadd.f32 %v1293_v17, %v2725_v15  ;;  %v1295_v54 = vpop.f32.mrb[3].mxu1  ;;  %v1235_v14 = vadd.f32 %v1234_v27, %v2725_v15  ;;  %v1374_v57 = vmax.f32 %v1290_v9, 0.0  ;;  %v1373_v1 = vmax.f32 %v1231_v53, 0.0 }
 0x1db   : > { %v1296_v21 = vadd.f32 %v1295_v54, %v2725_v15  ;;  %v1377_v40 = vmax.f32 %v1233_v30, 0.0  ;;  %v1375_v34 = vmax.f32 %v1292_v35, 0.0  ;;  %v1436_v27 = vsel %vm1175_vm0, 65535, %v2830_v26 }
 0x1dc   : > { %v1379_v36 = vmax.f32 %v1294_v31, 0.0  ;;  %v1378_v58 = vmax.f32 %v1235_v14, 0.0 }
 0x1dd   : > { %v1380_v16 = vmax.f32 %v1296_v21, 0.0  ;;  %v1399_v50 = vpack.c.bf16 %v1377_v40, %v1372_v3 }
 0x1de   : > { %v2739_v20 = vpack.c.bf16 %v1379_v36, %v1374_v57  ;;  %v1400_v47 = vpack.c.bf16 %v1378_v58, %v1373_v1  ;;  %v1238_v60 = vpop.f32.mrb[4].mxu0 }
 0x1df   : > { %v2741_v22 = vpack.c.bf16 %v1380_v16, %v1375_v34  ;;  %v1299_v7 = vpop.f32.mrb[4].mxu1  ;;  %v1239_v2 = vadd.f32 %v1238_v60, %v2735_v32  ;;  %v1240_v51 = vpop.f32.mrb[5].mxu0  ;;  %v1988_v16 = vld [vmem:[%s2805_s5] sm:$0xff]  }
 0x1e0   : > { %v1300_v12 = vadd.f32 %v1299_v7, %v2735_v32  ;;  %v1301_v13 = vpop.f32.mrb[5].mxu1  ;;  %v1241_v41 = vadd.f32 %v1240_v51, %v2735_v32  ;;  %v1242_v46 = vpop.f32.mrb[6].mxu0  ;;  %1452 = vmatprep.subr.bf16.mxu1 %v1400_v47 }
 0x1e1   : > { %v1302_v37 = vadd.f32 %v1301_v13, %v2735_v32  ;;  %v1303_v59 = vpop.f32.mrb[6].mxu1  ;;  %v1243_v63 = vadd.f32 %v1242_v46, %v2737_v18  ;;  %v1244_v33 = vpop.f32.mrb[7].mxu0  ;;  %1453 = vmatpush1.bf16.msra.mxu1 %v1399_v50  ;;  %v1382_v43 = vmax.f32 %v1239_v2, 0.0 }
 0x1e2   : > { %v1304_v55 = vadd.f32 %v1303_v59, %v2737_v18  ;;  %v1305_v28 = vpop.f32.mrb[7].mxu1  ;;  %v1245_v45 = vadd.f32 %v1244_v33, %v2737_v18  ;;  %v1384_v6 = vmax.f32 %v1300_v12, 0.0  ;;  %v1383_v8 = vmax.f32 %v1241_v41, 0.0 }
 0x1e3   : > { %v1306_v39 = vadd.f32 %v1305_v28, %v2737_v18  ;;  %v1387_v48 = vmax.f32 %v1243_v63, 0.0  ;;  %v1385_v11 = vmax.f32 %v1302_v37, 0.0 }
 0x1e4   : > { %v1389_v5 = vmax.f32 %v1304_v55, 0.0  ;;  %v1388_v56 = vmax.f32 %v1245_v45, 0.0 }
 0x1e5   : > { %v1390_v4 = vmax.f32 %v1306_v39, 0.0  ;;  %v1404_v24 = vpack.c.bf16 %v1387_v48, %v1382_v43 }
 0x1e6   : > { %v1406_v19 = vpack.c.bf16 %v1389_v5, %v1384_v6  ;;  %v1405_v38 = vpack.c.bf16 %v1388_v56, %v1383_v8  ;;  %v1248_v29 = vpop.f32.mrb[8].mxu0  ;;  %v1419_v5 = vpop.permute.xlu1 %1418 }
 0x1e7   : > { %v1407_v44 = vpack.c.bf16 %v1390_v4, %v1385_v11  ;;  %v1309_v52 = vpop.f32.mrb[8].mxu1  ;;  %v1249_v10 = vadd.f32 %v1248_v29, %v2751_v49  ;;  %v1250_v61 = vpop.f32.mrb[9].mxu0 }
 0x1e8   : > { %v1311_v9 = vpop.f32.mrb[9].mxu1  ;;  %v1251_v23 = vadd.f32 %v1250_v61, %v2751_v49  ;;  %v1252_v25 = vpop.f32.mrb[10].mxu0  ;;  %1454 = vmatprep.subr.bf16.mxu1 %v1405_v38  ;;  %v1310_v40 = vadd.f32 %v1309_v52, %v2751_v49 }
 0x1e9   : > { %v1313_v53 = vpop.f32.mrb[10].mxu1  ;;  %v1392_v35 = vmax.f32 %v1249_v10, 0.0  ;;  %v1253_v42 = vpop.f32.mrb[11].mxu0  ;;  %1455 = vmatpush1.bf16.msra.mxu1 %v1404_v24  ;;  %v1312_v14 = vadd.f32 %v1311_v9, %v2751_v49 }
 0x1ea   : > { %v1314_v17 = vpop.f32.mrb[11].mxu1  ;;  %v1393_v30 = vmax.f32 %v1251_v23, 0.0  ;;  %v1394_v60 = vmax.f32 %v1310_v40, 0.0  ;;  %v1424_v4 = vpop.permute.xlu0 %1423 }
 0x1eb   : > { %v1409_v31 = vpack.c.bf16 %v1392_v35, %v1392_v35  ;;  %v1395_v34 = vmax.f32 %v1312_v14, 0.0 }
 0x1ec   : > { %v1410_v54 = vpack.c.bf16 %v1393_v30, %v1393_v30  ;;  %v1411_v13 = vpack.c.bf16 %v1394_v60, %v1394_v60 }
 0x1ed   : > { %v1438_v57 = vand.u32 %v1436_v27, %v1409_v31  ;;  %v1412_v12 = vpack.c.bf16 %v1395_v34, %v1395_v34 }
 0x1ee   : > { %v1441_v21 = vand.u32 %v1436_v27, %v1410_v54  ;;  %v1350_v3 = vpop.f32.mrb[12].mxu0  ;;  %v1444_v63 = vand.u32 %v1436_v27, %v1411_v13 }
 0x1ef   : > { %v1351_v36 = vadd.f32 %v1350_v3, %v2723_v62  ;;  %v1908_v1 = vpop.f32.mrb[13].mxu0  ;;  %v1447_v37 = vand.u32 %v1436_v27, %v1412_v12 }
 0x1f0   : > { %v1353_v58 = vpop.f32.mrb[14].mxu0  ;;  %1456 = vmatprep.subr.bf16.mxu1 %v1441_v21 }
 0x1f1   : > { %v1354_v50 = vadd.f32 %v1353_v58, %v2725_v15  ;;  %v1909_v47 = vpop.f32.mrb[15].mxu0  ;;  %1457 = vmatpush1.bf16.msra.mxu1 %v1438_v57  ;;  %v1376_v7 = vmax.f32 %v1351_v36, 0.0 }
 0x1f2   : > { %1495 = vmatprep.subr.bf16.mxu1 %v2741_v22 }
 0x1f3   : > { %v1381_v2 = vmax.f32 %v1354_v50, 0.0 }
 0x1f4   : > { %1874 = vmatmul.mubr.msk.bf16.vlgmr.msra.gmra.mrb[12].mxu1 %vm1431_vm4, %v1988_v16 }
 0x1f5   : > { %v1403_v62 = vpack.c.bf16 %v1381_v2, %v1376_v7  ;;  %1496 = vmatpush1.bf16.msra.mxu1 %v2739_v20  ;;  %1527 = vmatprep.mubr.bf16.mxu1 %v2830_v26  ;;  %v1599_v7 = vpop.permute.xlu1 %1598 }
 0x1f6   : > { %v1358_v51 = vpop.f32.mrb[16].mxu0  ;;  %1497 = vmatprep.subr.bf16.mxu1 %v1407_v44 }
 0x1f7   : > { %v1359_v15 = vadd.f32 %v1358_v51, %v2735_v32  ;;  %v1912_v41 = vpop.f32.mrb[17].mxu0  ;;  %1919 = vmatpush3.bf16.msra.mxu0 %v1403_v62 }
 0x1f8   : > { %v1361_v22 = vpop.f32.mrb[18].mxu0  ;;  %1920 = vmatprep.subr.bf16.mxu0 %v2033_v0 }
 0x1f9   : > { %v1362_v46 = vadd.f32 %v1361_v22, %v2737_v18  ;;  %v1913_v59 = vpop.f32.mrb[19].mxu0  ;;  %1498 = vmatpush1.bf16.msra.mxu1 %v1406_v19  ;;  %v1386_v20 = vmax.f32 %v1359_v15, 0.0 }
 0x1fa   : > { %1499 = vmatprep.subr.bf16.mxu1 %v1447_v37 }
 0x1fb   : > { %v1391_v55 = vmax.f32 %v1362_v46, 0.0 }
 0x1fd   : > { %v1408_v33 = vpack.c.bf16 %v1391_v55, %v1386_v20  ;;  %1500 = vmatpush1.bf16.msra.mxu1 %v1444_v63 }
 0x1fe   : > { %v1366_v28 = vpop.f32.mrb[20].mxu0 }
 0x1ff   : > { %v1367_v45 = vadd.f32 %v1366_v28, %v2751_v49  ;;  %v1916_v32 = vpop.f32.mrb[21].mxu0  ;;  %1921 = vmatpush3.bf16.msra.mxu0 %v1408_v33 }
 0x200   : > { %v1369_v39 = vpop.f32.mrb[22].mxu0  ;;  %1875 = vmatmul.mubr.msk.bf16.vlgmr.msra.gmra.mrb[16].mxu1 %vm1431_vm4, %v1988_v16  ;;  %1922 = vmatprep.subr.bf16.mxu0 %v2033_v0 }
 0x201   : > { %v1396_v43 = vmax.f32 %v1367_v45, 0.0  ;;  %v1917_v18 = vpop.f32.mrb[23].mxu0  ;;  %1637 = vmatprep.mubr.bf16.mxu1 %v2830_v26 }
 0x203   : > { %v1413_v6 = vpack.c.bf16 %v1396_v43, %v1396_v43 }
 0x205   : > { %v1450_v48 = vand.u32 %v1436_v27, %v1413_v6 }
 0x207   : > { %1923 = vmatpush3.bf16.msra.mxu0 %v1450_v48 }
 0x208   : > { %1928 = vmatprep.subr.bf16.mxu0 %v2033_v0 }
 0x20a   : > { %1925 = vmatmul.mubr.msk.bf16.vlgmr.msra.gmra.mrb[24].mxu0 %vm1431_vm4, %v1988_v16 }
 0x20b   : > { %1930 = vmatprep.mubr.msk.bf16.mxu0 %vm2034_vm3, %v2033_v0  ;;  %v1589_v0 = vld [vmem:[%s2807_s7] sm:$0x3] }
 0x2c7   : > { %v1486_v8 = vpop.f32.mrb[12].mxu1 }
 0x2c8   : > { %v1487_v11 = vadd.f32 %v1486_v8, %v1419_v5  ;;  %v1488_v56 = vpop.f32.mrb[13].mxu1 }
 0x2c9   : > { %v1489_v49 = vadd.f32 %v1488_v56, %v1419_v5  ;;  %v1490_v24 = vpop.f32.mrb[14].mxu1 }
 0x2ca   : > { %v1491_v19 = vadd.f32 %v1490_v24, %v1424_v4  ;;  %v1492_v38 = vpop.f32.mrb[15].mxu1  ;;  %v1579_v29 = vmax.f32 %v1487_v11, 0.0 }
 0x2cb   : > { %v1493_v44 = vadd.f32 %v1492_v38, %v1424_v4  ;;  %v1580_v10 = vmax.f32 %v1489_v49, 0.0 }
 0x2cc   : > { %v1584_v52 = vmax.f32 %v1491_v19, 0.0 }
 0x2cd   : > { %v1585_v61 = vmax.f32 %v1493_v44, 0.0 }
 0x2ce   : > { %v1590_v9 = vpack.c.bf16 %v1584_v52, %v1579_v29 }
 0x2cf   : > { %v1591_v23 = vpack.c.bf16 %v1585_v61, %v1580_v10 }
 0x2d1   : > { %1605 = vmatprep.subr.bf16.mxu1 %v1591_v23 }
 0x2d2   : > { %1606 = vmatpush1.bf16.msra.mxu1 %v1590_v9 }
 0x2d3   : > { %v1529_v25 = vpop.f32.mrb[16].mxu1 }
 0x2d4   : > { %v1530_v53 = vadd.f32 %v1529_v25, %v1419_v5  ;;  %v1531_v35 = vpop.f32.mrb[17].mxu1 }
 0x2d5   : > { %v1532_v42 = vadd.f32 %v1531_v35, %v1419_v5  ;;  %v1533_v17 = vpop.f32.mrb[18].mxu1  ;;  %1877 = vmatmul.mubr.msk.bf16.vlgmr.msra.gmra.mrb[20].mxu1 %vm1601_vm5, %v1589_v0 }
 0x2d6   : > { %v1534_v30 = vadd.f32 %v1533_v17, %v1424_v4  ;;  %v1535_v31 = vpop.f32.mrb[19].mxu1  ;;  %1678 = vmatprep.mubr.bf16.mxu1 %v2830_v26  ;;  %v1581_v54 = vmax.f32 %v1530_v53, 0.0 }
 0x2d7   : > { %v1536_v27 = vadd.f32 %v1535_v31, %v1424_v4  ;;  %v1582_v21 = vmax.f32 %v1532_v42, 0.0 }
 0x2d8   : > { %v1586_v14 = vmax.f32 %v1534_v30, 0.0 }
 0x2d9   : > { %v1587_v3 = vmax.f32 %v1536_v27, 0.0 }
 0x2da   : > { %v1592_v57 = vpack.c.bf16 %v1586_v14, %v1581_v54 }
 0x2db   : > { %v1593_v40 = vpack.c.bf16 %v1587_v3, %v1582_v21 }
 0x2dd   : > { %v1572_v36 = vpop.f32.mrb[24].mxu0  ;;  %1646 = vmatprep.subr.bf16.mxu1 %v1593_v40 }
 0x2de   : > { %v1573_v1 = vadd.f32 %v1572_v36, %v1419_v5  ;;  %v1926_v34 = vpop.f32.mrb[25].mxu0  ;;  %1647 = vmatpush1.bf16.msra.mxu1 %v1592_v57 }
 0x2df   : > { %v1575_v58 = vpop.f32.mrb[26].mxu0 }
 0x2e0   : > { %v1576_v16 = vadd.f32 %v1575_v58, %v1424_v4  ;;  %v1927_v50 = vpop.f32.mrb[27].mxu0  ;;  %v1583_v47 = vmax.f32 %v1573_v1, 0.0 }
 0x2e1   : > { %1878 = vmatmul.mubr.msk.bf16.vlgmr.msra.gmra.mrb[24].mxu1 %vm1601_vm5, %v1589_v0 }
 0x2e2   : > { %v1588_v60 = vmax.f32 %v1576_v16, 0.0 }
 0x2e4   : > { %v1594_v26 = vpack.c.bf16 %v1588_v60, %v1583_v47 }
 0x2e6   : > { %1929 = vmatpush3.bf16.msra.mxu0 %v1594_v26 }
 0x2e9   : > { %1931 = vmatmul.mubr.msk.bf16.vlgmr.msra.gmra.mrb[28].mxu0 %vm1601_vm5, %v1589_v0 }
 0x3a8   : > { %v1639_v2 = vpop.f32.mrb[20].mxu1 }
 0x3a9   : > { %v1640_v12 = vadd.f32 %v1639_v2, %v1599_v7  ;;  %v1641_v62 = vpop.f32.mrb[21].mxu1 }
 0x3aa   : > { %v1642_v51 = vadd.f32 %v1641_v62, %v1599_v7  ;;  %v1643_v13 = vpop.f32.mrb[22].mxu1 }
 0x3ab   : > { %1995 = vtanh.f32 %v1640_v12  ;;  %v1644_v15 = vpop.f32.mrb[23].mxu1 }
 0x3ac   : > { %1997 = vtanh.f32 %v1642_v51 }
 0x3b4   : > { %v1680_v41 = vpop.f32.mrb[24].mxu1 }
 0x3b5   : > { %v1996_v37 = vpop.eup %1995  ;;  %v1681_v22 = vadd.f32 %v1680_v41, %v1599_v7  ;;  %v1682_v46 = vpop.f32.mrb[25].mxu1 }
 0x3b6   : > { %v1998_v59 = vpop.eup %1997  ;;  %v1732_v63 = vmul.f32 0.005, %v1996_v37  ;;  %v1683_v20 = vadd.f32 %v1682_v46, %v1599_v7  ;;  %v1684_v55 = vpop.f32.mrb[26].mxu1 }
 0x3b7   : > { %v1733_v33 = vmul.f32 0.005, %v1998_v59  ;;  %1999 = vtanh.f32 %v1681_v22  ;;  %v1685_v28 = vpop.f32.mrb[27].mxu1 }
 0x3b8   : > { %2001 = vtanh.f32 %v1683_v20 }
 0x3b9   : > { %v1741_v45 = vcombine.low %v1732_v63, %v1733_v33 }
 0x3bb   : > { %1745 = vst [vmem:[%s390_s20] sm:$0x77] %v1741_v45 }
 0x3bc   : > { %v1721_v32 = vpop.f32.mrb[28].mxu0 }
 0x3bd   : > { %v1722_v39 = vadd.f32 %v1721_v32, %v1599_v7  ;;  %v1932_v43 = vpop.f32.mrb[29].mxu0 }
 0x3be   : > { %v1724_v18 = vpop.f32.mrb[30].mxu0 }
 0x3bf   : > { %2003 = vtanh.f32 %v1722_v39  ;;  %v1933_v6 = vpop.f32.mrb[31].mxu0 }
 0x3c1   : > { %v2000_v48 = vpop.eup %1999 }
 0x3c2   : > { %v2002_v5 = vpop.eup %2001  ;;  %v1734_v8 = vmul.f32 0.005, %v2000_v48 }
 0x3c3   : > { %v1735_v11 = vmul.f32 0.005, %v2002_v5 }
 0x3c5   : > { %v1742_v56 = vcombine.low %v1734_v8, %v1735_v11 }
 0x3c7   : > { %1746 = vst [vmem:[%s390_s20 + $0x8] sm:$0x77] %v1742_v56 }
 0x3c9   : > { %v2004_v4 = vpop.eup %2003 }
 0x3ca   : > { %v1736_v49 = vmul.f32 0.005, %v2004_v4 }
 0x3cc   : > { %1747 = vst [vmem:[%s390_s20 + $0x10] sm:$0x7] %v1736_v49 }
 0x3cd PF: > { %s19_s11 = sadd.s32 1, %s2027_s11   ;;  %s2831_s30 = smov %s2023_s10 }
 0x3ce   : > { %p16_p5 = scmp.ge.s32.totalorder %s19_s11, 4   ;;  %s2832_s10 = smov %s2834_s12 }
 0x3d0   :  { %18 = sbr.rel (!%p16_p5) target bundleno = 2 (0x2), region = 89 }

</bundles_post_ra>
